<compile_context>
chip_gen: v5e
topology: v5e:2x2
jax: 0.10.0
libtpu: 0.0.40
codegen_flags: <defaults>
</compile_context>

<pallas_src>
import functools

import jax
import jax.numpy as jnp
from jax.experimental import pallas as pl
from jax.experimental.pallas import tpu as pltpu


def _conv_bn_relu_kernel(w_ref, x_ref, gamma_ref, beta_ref, o_ref):
    # w_ref:     (Cout, Cin)  bf16   -- conv weight (1x1 kernel squeezed)
    # x_ref:     (Cin,  HW)   bf16   -- activations, free reshape of NCHW (N=1)
    # gamma_ref: (Cout, 1)    f32
    # beta_ref:  (Cout, 1)    f32
    # o_ref:     (Cout, HW)   f32
    eps = jnp.float32(1e-5)

    # 1x1 conv == matmul on the MXU; bf16 inputs, f32 accumulation.
    y = jnp.dot(w_ref[...], x_ref[...],
                preferred_element_type=jnp.float32)          # (Cout, HW) f32

    # BatchNorm2d (training mode): biased batch statistics per output channel
    # (reduction over the HW lane axis, goes to the XLU).
    m = jnp.float32(y.shape[1])
    mean = jnp.sum(y, axis=1, keepdims=True) / m             # (Cout, 1)
    d = y - mean
    var = jnp.sum(d * d, axis=1, keepdims=True) / m          # biased var >= 0

    # Fold normalize + affine into a single scale/shift (EUP rsqrt).
    scale = gamma_ref[...] * jax.lax.rsqrt(var + eps)        # (Cout, 1)
    shift = beta_ref[...] - mean * scale                     # (Cout, 1)

    # Normalize + affine + ReLU in one pass over the (Cout, HW) tile.
    o_ref[...] = jnp.maximum(y * scale + shift, 0.0)


def prepare_params(w_oihw, gamma, beta):
    """One-time parameter prep (hoisted out of the per-call hot path)."""
    cout, cin = w_oihw.shape[0], w_oihw.shape[1]
    w_mat = w_oihw.reshape(cout, cin).astype(jnp.bfloat16)       # (Cout, Cin)
    gamma2 = gamma.reshape(cout, 1).astype(jnp.float32)          # (Cout, 1)
    beta2 = beta.reshape(cout, 1).astype(jnp.float32)            # (Cout, 1)
    return w_mat, gamma2, beta2


@jax.jit
def conv_bn_relu(x_nchw, w_mat, gamma2, beta2):
    """x_nchw: (N, Cin, H, W); w_mat: (Cout, Cin) bf16; gamma2/beta2: (Cout,1) f32."""
    n, cin, h, wid = x_nchw.shape
    cout = w_mat.shape[0]
    hw = n * h * wid

    if n == 1:
        # Free reshape: contiguous NCHW with N=1 is already (Cin, H*W).
        x_mat = x_nchw.reshape(cin, hw)
    else:
        # General fallback (not hit for this module): gather batch into lanes.
        x_mat = jnp.transpose(x_nchw, (1, 0, 2, 3)).reshape(cin, hw)
    x_mat = x_mat.astype(jnp.bfloat16)

    # Single-block design: the whole problem lives in one VMEM-resident block.
    # Rough double-buffered footprint guard (v7x has only 64 MiB VMEM); at
    # (Cin=736, Cout=128, HW=49) this is well under 1 MiB.
    # TODO(synk): add an HW-tiled grid + two-pass BN (partial sum/sumsq then
    # finalize) if this layer is ever reused with much larger N*H*W.
    vmem_est = 2 * (cin * hw * 2 + cout * cin * 2 + cout * hw * 4)
    assert vmem_est < 48 * 1024 * 1024, "single-block kernel would overflow VMEM"

    out_mat = pl.pallas_call(
        _conv_bn_relu_kernel,
        out_shape=jax.ShapeDtypeStruct((cout, hw), jnp.float32),
        grid=(1,),
        in_specs=[
            pl.BlockSpec((cout, cin), lambda i: (0, 0)),
            pl.BlockSpec((cin, hw), lambda i: (0, 0)),
            pl.BlockSpec((cout, 1), lambda i: (0, 0)),
            pl.BlockSpec((cout, 1), lambda i: (0, 0)),
        ],
        out_specs=pl.BlockSpec((cout, hw), lambda i: (0, 0)),
        compiler_params=pltpu.CompilerParams(
            dimension_semantics=("arbitrary",)),
    )(w_mat, x_mat, gamma2, beta2)

    if n == 1:
        # Free reshape back to NCHW.
        return out_mat.reshape(1, cout, h, wid)
    # General fallback: (Cout, N*HW) -> (N, Cout, H, W)
    return jnp.transpose(out_mat.reshape(cout, n, h, wid), (1, 0, 2, 3))


def _reference(x_nchw, w_oihw, gamma, beta):
    """Pure-JAX reference of the PyTorch forward (training-mode BN), with the
    conv operands rounded to bf16 to mirror the kernel's MXU feed."""
    n, cin, h, wid = x_nchw.shape
    cout = w_oihw.shape[0]
    hw = n * h * wid
    xm = x_nchw.reshape(cin, hw).astype(jnp.bfloat16).astype(jnp.float32)
    wm = w_oihw.reshape(cout, cin).astype(jnp.bfloat16).astype(jnp.float32)
    y = wm @ xm                                              # (Cout, HW) f32
    mean = jnp.mean(y, axis=1, keepdims=True)
    var = jnp.mean((y - mean) ** 2, axis=1, keepdims=True)   # biased
    yn = (y - mean) * jax.lax.rsqrt(var + jnp.float32(1e-5))
    out = jnp.maximum(yn * gamma.reshape(-1, 1) + beta.reshape(-1, 1), 0.0)
    return out.reshape(n, cout, h, wid)


if __name__ == "__main__":
    # Shapes consistent with the module: x393 = (1, 736, 7, 7), Cout = 128.
    N, C_IN, H, W = 1, 736, 7, 7
    C_OUT = 128

    key = jax.random.PRNGKey(0)
    kx, kw, kg, kb = jax.random.split(key, 4)

    x = jax.random.normal(kx, (N, C_IN, H, W), dtype=jnp.float32)
    # Deterministic synthetic init (kaiming-uniform-ish scale for the conv).
    bound = 1.0 / jnp.sqrt(jnp.float32(C_IN))
    w = jax.random.uniform(kw, (C_OUT, C_IN, 1, 1), dtype=jnp.float32,
                           minval=-bound, maxval=bound)
    gamma = 1.0 + 0.1 * jax.random.normal(kg, (C_OUT,), dtype=jnp.float32)
    beta = 0.1 * jax.random.normal(kb, (C_OUT,), dtype=jnp.float32)

    # One-time parameter prep (outside the hot path).
    w_mat, gamma2, beta2 = prepare_params(w, gamma, beta)
    w_mat, gamma2, beta2 = jax.block_until_ready((w_mat, gamma2, beta2))

    out = conv_bn_relu(x, w_mat, gamma2, beta2)
    out = jax.block_until_ready(out)

    # Sanity + numerical checks.
    assert out.shape == (N, C_OUT, H, W), out.shape
    assert bool(jnp.all(out >= 0.0))            # ReLU
    assert bool(jnp.all(jnp.isfinite(out)))
    ref = jax.block_until_ready(_reference(x, w, gamma, beta))
    max_err = float(jnp.max(jnp.abs(out - ref)))
    assert max_err < 5e-3, f"max abs error vs reference: {max_err}"

    print("KERNEL_OK")
</pallas_src>

<mosaic_0001>
module attributes {stable_mosaic.version = 11 : i64} {
  func.func @_conv_bn_relu_kernel(%arg0: i32, %arg1: memref<128x736xbf16, #tpu.memory_space<vmem>>, %arg2: memref<736x49xbf16, #tpu.memory_space<vmem>>, %arg3: memref<128x1xf32, #tpu.memory_space<vmem>>, %arg4: memref<128x1xf32, #tpu.memory_space<vmem>>, %arg5: memref<128x49xf32, #tpu.memory_space<vmem>>) attributes {dimension_semantics = [#tpu.dimension_semantics<arbitrary>], iteration_bounds = array<i64: 1>, scalar_prefetch = 0 : i64, scratch_operands = 0 : i64, tpu.core_type = #tpu.core_type<tc>, window_params = [{pipeline_mode = #tpu.pipeline_mode<synchronous>, transform_indices = @transform_0, window_bounds = array<i64: 128, 736>}, {pipeline_mode = #tpu.pipeline_mode<synchronous>, transform_indices = @transform_1, window_bounds = array<i64: 736, 49>}, {pipeline_mode = #tpu.pipeline_mode<synchronous>, transform_indices = @transform_2, window_bounds = array<i64: 128, 1>}, {pipeline_mode = #tpu.pipeline_mode<synchronous>, transform_indices = @transform_3, window_bounds = array<i64: 128, 1>}, {pipeline_mode = #tpu.pipeline_mode<synchronous>, transform_indices = @transform_4, window_bounds = array<i64: 128, 49>}]} {
    %c0 = arith.constant 0 : index
    %c0_0 = arith.constant 0 : index
    %0 = vector.load %arg1[%c0, %c0_0] : memref<128x736xbf16, #tpu.memory_space<vmem>>, vector<128x736xbf16>
    %c0_1 = arith.constant 0 : index
    %c0_2 = arith.constant 0 : index
    %1 = vector.load %arg2[%c0_1, %c0_2] : memref<736x49xbf16, #tpu.memory_space<vmem>>, vector<736x49xbf16>
    %cst = arith.constant dense<0.000000e+00> : vector<128x49xf32>
    %2 = tpu.matmul %0, %1, %cst {dimension_numbers = #tpu.dot_dimension_numbers<[1], [0], [0], [1], [0, 0, 1, 1], [], []>} : vector<128x736xbf16>, vector<736x49xbf16>, vector<128x49xf32> -> vector<128x49xf32>
    %cst_3 = arith.constant dense<0.000000e+00> : vector<128xf32>
    %3 = vector.multi_reduction <add>, %2, %cst_3 [1] : vector<128x49xf32> to vector<128xf32>
    %4 = vector.shape_cast %3 : vector<128xf32> to vector<128x1xf32>
    %cst_4 = arith.constant 4.900000e+01 : f32
    %5 = vector.broadcast %cst_4 : f32 to vector<128x1xf32>
    %6 = arith.divf %4, %5 : vector<128x1xf32>
    %7 = vector.broadcast %6 : vector<128x1xf32> to vector<128x49xf32>
    %8 = arith.subf %2, %7 : vector<128x49xf32>
    %9 = arith.mulf %8, %8 : vector<128x49xf32>
    %cst_5 = arith.constant dense<0.000000e+00> : vector<128xf32>
    %10 = vector.multi_reduction <add>, %9, %cst_5 [1] : vector<128x49xf32> to vector<128xf32>
    %11 = vector.shape_cast %10 : vector<128xf32> to vector<128x1xf32>
    %cst_6 = arith.constant 4.900000e+01 : f32
    %12 = vector.broadcast %cst_6 : f32 to vector<128x1xf32>
    %13 = arith.divf %11, %12 : vector<128x1xf32>
    %c0_7 = arith.constant 0 : index
    %c0_8 = arith.constant 0 : index
    %14 = vector.load %arg3[%c0_7, %c0_8] : memref<128x1xf32, #tpu.memory_space<vmem>>, vector<128x1xf32>
    %cst_9 = arith.constant 9.99999974E-6 : f32
    %15 = vector.broadcast %cst_9 : f32 to vector<128x1xf32>
    %16 = arith.addf %13, %15 : vector<128x1xf32>
    %17 = math.rsqrt %16 : vector<128x1xf32>
    %18 = arith.mulf %14, %17 : vector<128x1xf32>
    %c0_10 = arith.constant 0 : index
    %c0_11 = arith.constant 0 : index
    %19 = vector.load %arg4[%c0_10, %c0_11] : memref<128x1xf32, #tpu.memory_space<vmem>>, vector<128x1xf32>
    %20 = arith.mulf %6, %18 : vector<128x1xf32>
    %21 = arith.subf %19, %20 : vector<128x1xf32>
    %22 = vector.broadcast %18 : vector<128x1xf32> to vector<128x49xf32>
    %23 = arith.mulf %2, %22 : vector<128x49xf32>
    %24 = vector.broadcast %21 : vector<128x1xf32> to vector<128x49xf32>
    %25 = arith.addf %23, %24 : vector<128x49xf32>
    %cst_12 = arith.constant 0.000000e+00 : f32
    %26 = vector.broadcast %cst_12 : f32 to vector<128x49xf32>
    %27 = arith.maximumf %25, %26 : vector<128x49xf32>
    %c0_13 = arith.constant 0 : index
    %c0_14 = arith.constant 0 : index
    %28 = vector.load %arg5[%c0_13, %c0_14] : memref<128x49xf32, #tpu.memory_space<vmem>>, vector<128x49xf32>
    tpu.vector_store %arg5[%c0_13, %c0_14], %27 {strides = array<i32>} : memref<128x49xf32, #tpu.memory_space<vmem>>, vector<128x49xf32>,
    return
  }
  func.func @transform_0(%arg0: i32) -> (i32, i32) {
    %c0_i32 = arith.constant 0 : i32
    %c0_i32_0 = arith.constant 0 : i32
    %c0_i32_1 = arith.constant 0 : i32
    return %c0_i32, %c0_i32_0 : i32, i32
  }
  func.func @transform_1(%arg0: i32) -> (i32, i32) {
    %c0_i32 = arith.constant 0 : i32
    %c0_i32_0 = arith.constant 0 : i32
    %c0_i32_1 = arith.constant 0 : i32
    return %c0_i32, %c0_i32_0 : i32, i32
  }
  func.func @transform_2(%arg0: i32) -> (i32, i32) {
    %c0_i32 = arith.constant 0 : i32
    %c0_i32_0 = arith.constant 0 : i32
    %c0_i32_1 = arith.constant 0 : i32
    return %c0_i32, %c0_i32_0 : i32, i32
  }
  func.func @transform_3(%arg0: i32) -> (i32, i32) {
    %c0_i32 = arith.constant 0 : i32
    %c0_i32_0 = arith.constant 0 : i32
    %c0_i32_1 = arith.constant 0 : i32
    return %c0_i32, %c0_i32_0 : i32, i32
  }
  func.func @transform_4(%arg0: i32) -> (i32, i32) {
    %c0_i32 = arith.constant 0 : i32
    %c0_i32_0 = arith.constant 0 : i32
    %c0_i32_1 = arith.constant 0 : i32
    return %c0_i32, %c0_i32_0 : i32, i32
  }
}

</mosaic_0001>

<bundles_post_ra>
// kernel: conv_bn_relu.1
= control target key start
LH: loop header
LB: loop body
LE: loop exit
PB: predicated region body
PF: predicated region fallthrough
CT: control target
= control target key end

     0   :  { %vm666_vm0 = vcmask 785408   ;;  %vm985_vm1 = vcmask 400384   ;;  %s3073_s1 = inlined_call_operand.vmem [shape: bf16[736,49], index: 1, kind: input, shape index: {}]   ;;  %s3074_s0 = inlined_call_operand.vmem [shape: bf16[128,736], index: 0, kind: input, shape index: {}]   ;;  %s3075_s2 = inlined_call_operand.vmem [shape: f32[128,1], index: 2, kind: input, shape index: {}]   ;;  %s3076_s3 = inlined_call_operand.vmem [shape: f32[128,1], index: 3, kind: input, shape index: {}]   ;;  %s3077_s4 = inlined_call_operand.vmem [shape: f32[128,49], index: 4, kind: output, shape index: {}]  }
   0x1   :  { %v2076_v0 = vld [vmem:[%s3073_s1 + $0x38] sm:$0xff]  ;;  %v2075_v2 = vld [vmem:[%s3073_s1 + $0x30] sm:$0xff]  ;;  %v2074_v4 = vld [vmem:[%s3073_s1 + $0x28] sm:$0xff] }
   0x2   :  { %v2084_v1 = vld [vmem:[%s3073_s1 + $0x78] sm:$0xff]  ;;  %2115 = vmatpush.bf16.msra.mxu2 %v2076_v0  ;;  %v2083_v3 = vld [vmem:[%s3073_s1 + $0x70] sm:$0xff]  ;;  %691 = vmatpush.bf16.msra.mxu0 %v2076_v0  ;;  %v2082_v5 = vld [vmem:[%s3073_s1 + $0x68] sm:$0xff] }
   0x3   :  { %2123 = vmatpush.bf16.msra.mxu3 %v2084_v1  ;;  %740 = vmatpush.bf16.msra.mxu1 %v2084_v1  ;;  %v2073_v6 = vld [vmem:[%s3073_s1 + $0x20] sm:$0xff]  ;;  %v2072_v8 = vld [vmem:[%s3073_s1 + $0x18] sm:$0xff]  ;;  %v2071_v10 = vld [vmem:[%s3073_s1 + $0x10] sm:$0xff] }
   0x4   :  { %v2081_v7 = vld [vmem:[%s3073_s1 + $0x60] sm:$0xff]  ;;  %v2080_v9 = vld [vmem:[%s3073_s1 + $0x58] sm:$0xff]  ;;  %v2079_v11 = vld [vmem:[%s3073_s1 + $0x50] sm:$0xff] }
   0x5   :  { %v2070_v12 = vld [vmem:[%s3073_s1 + $0x8] sm:$0xff]  ;;  %v2069_v14 = vld [vmem:[%s3073_s1] sm:$0xff]  ;;  %v2048_v17 = vld [vmem:[%s3074_s0 + $0xd4] sm:$0xf0] }
   0x6   :  { %2116 = vmatpush.bf16.msra.mxu2 %v2075_v2  ;;  %692 = vmatpush.bf16.msra.mxu0 %v2075_v2  ;;  %v2078_v13 = vld [vmem:[%s3073_s1 + $0x48] sm:$0xff]  ;;  %v2077_v15 = vld [vmem:[%s3073_s1 + $0x40] sm:$0xff]  ;;  %v1737_v19 = vld [vmem:[%s3074_s0 + $0xd8] sm:$0xf0] }
   0x7   :  { %2124 = vmatpush.bf16.msra.mxu3 %v2083_v3  ;;  %741 = vmatpush.bf16.msra.mxu1 %v2083_v3  ;;  %v1735_v16 = vld [vmem:[%s3074_s0 + $0xc0] sm:$0xf]  ;;  %v2045_v18 = vld [vmem:[%s3074_s0 + $0xc4] sm:$0xf]  ;;  %v2024_v21 = vld [vmem:[%s3074_s0 + $0x14] sm:$0xf0] }
   0x8   :  { %v1639_v20 = vld [vmem:[%s3074_s0] sm:$0xf]  ;;  %v2021_v22 = vld [vmem:[%s3074_s0 + $0x4] sm:$0xf]  ;;  %v1641_v23 = vld [vmem:[%s3074_s0 + $0x18] sm:$0xf0]  ;;  %v1736_v26 = vor.u32 %v2048_v17, %v1735_v16  ;;  %v1740_v27 = vor.u32 %v2045_v18, %v1737_v19 }
   0x9   :  { %v2092_v24 = vld [vmem:[%s3073_s1 + $0xb8] sm:$0xff]  ;;  %v1640_v28 = vor.u32 %v2024_v21, %v1639_v20  ;;  %v1644_v29 = vor.u32 %v2021_v22, %v1641_v23  ;;  %v2114_v31 = vld [vmem:[%s3073_s1 + $0x168] sm:$0xff]  ;;  %v2091_v32 = vld [vmem:[%s3073_s1 + $0xb0] sm:$0xff] }
   0xa   :  { %2117 = vmatpush.bf16.msra.mxu2 %v2074_v4  ;;  %693 = vmatpush.bf16.msra.mxu0 %v2074_v4  ;;  %v2100_v25 = vld [vmem:[%s3073_s1 + $0xf8] sm:$0xff]  ;;  %v2099_v33 = vld [vmem:[%s3073_s1 + $0xf0] sm:$0xff]  ;;  %v2113_v35 = vld [vmem:[%s3073_s1 + $0x160] sm:$0xff] }
   0xb   :  { %2125 = vmatpush.bf16.msra.mxu3 %v2082_v5  ;;  %742 = vmatpush.bf16.msra.mxu1 %v2082_v5  ;;  %v2108_v30 = vld [vmem:[%s3073_s1 + $0x138] sm:$0xff]  ;;  %v2107_v34 = vld [vmem:[%s3073_s1 + $0x130] sm:$0xff]  ;;  %v2090_v36 = vld [vmem:[%s3073_s1 + $0xa8] sm:$0xff] }
   0xc   :  { %v2098_v37 = vld [vmem:[%s3073_s1 + $0xe8] sm:$0xff]  ;;  %v2112_v39 = vld [vmem:[%s3073_s1 + $0x158] sm:$0xff]  ;;  %v1759_v40 = vld [vmem:[%s3074_s0 + $0xf0] sm:$0xf] }
   0xd   :  { %v2106_v38 = vld [vmem:[%s3073_s1 + $0x128] sm:$0xff]  ;;  %v2089_v41 = vld [vmem:[%s3073_s1 + $0xa0] sm:$0xff]  ;;  %v2051_v44 = vld [vmem:[%s3074_s0 + $0xf4] sm:$0xf] }
   0xe   :  { %2118 = vmatpush.bf16.msra.mxu2 %v2073_v6  ;;  %694 = vmatpush.bf16.msra.mxu0 %v2073_v6  ;;  %v2097_v42 = vld [vmem:[%s3073_s1 + $0xe0] sm:$0xff]  ;;  %v2054_v43 = vld [vmem:[%s3074_s0 + $0x104] sm:$0xf0]  ;;  %v1761_v45 = vld [vmem:[%s3074_s0 + $0x108] sm:$0xf0] }
   0xf   :  { %2126 = vmatpush.bf16.msra.mxu3 %v2081_v7  ;;  %743 = vmatpush.bf16.msra.mxu1 %v2081_v7  ;;  %v1663_v46 = vld [vmem:[%s3074_s0 + $0x30] sm:$0xf]  ;;  %v2030_v47 = vld [vmem:[%s3074_s0 + $0x44] sm:$0xf0]  ;;  %v2027_v48 = vld [vmem:[%s3074_s0 + $0x34] sm:$0xf]  ;;  %v1760_v54 = vor.u32 %v2054_v43, %v1759_v40  ;;  %v1764_v55 = vor.u32 %v2051_v44, %v1761_v45 }
  0x10   :  { %v1665_v49 = vld [vmem:[%s3074_s0 + $0x48] sm:$0xf0]  ;;  %v2105_v50 = vld [vmem:[%s3073_s1 + $0x120] sm:$0xff]  ;;  %v2111_v51 = vld [vmem:[%s3073_s1 + $0x150] sm:$0xff]  ;;  %v1664_v56 = vor.u32 %v2030_v47, %v1663_v46 }
  0x11   :  { %v2088_v52 = vld [vmem:[%s3073_s1 + $0x98] sm:$0xff]  ;;  %v1668_v57 = vor.u32 %v2027_v48, %v1665_v49  ;;  %v2087_v59 = vld [vmem:[%s3073_s1 + $0x90] sm:$0xff]  ;;  %v2110_v61 = vld [vmem:[%s3073_s1 + $0x148] sm:$0xff] }
  0x12   :  { %2119 = vmatpush.bf16.msra.mxu2 %v2072_v8  ;;  %695 = vmatpush.bf16.msra.mxu0 %v2072_v8  ;;  %v2096_v53 = vld [vmem:[%s3073_s1 + $0xd8] sm:$0xff]  ;;  %v2095_v60 = vld [vmem:[%s3073_s1 + $0xd0] sm:$0xff]  ;;  %v2086_v63 = vld [vmem:[%s3073_s1 + $0x88] sm:$0xff] }
  0x13   :  { %2127 = vmatpush.bf16.msra.mxu3 %v2080_v9  ;;  %744 = vmatpush.bf16.msra.mxu1 %v2080_v9  ;;  %v2104_v58 = vld [vmem:[%s3073_s1 + $0x118] sm:$0xff]  ;;  %v2103_v62 = vld [vmem:[%s3073_s1 + $0x110] sm:$0xff]  ;;  %v2094_v0 = vld [vmem:[%s3073_s1 + $0xc8] sm:$0xff] }
  0x14   :  { %v2102_v1 = vld [vmem:[%s3073_s1 + $0x108] sm:$0xff]  ;;  %v2085_v2 = vld [vmem:[%s3073_s1 + $0x80] sm:$0xff]  ;;  %v2060_v5 = vld [vmem:[%s3074_s0 + $0x134] sm:$0xf0] }
  0x15   :  { %v2093_v3 = vld [vmem:[%s3073_s1 + $0xc0] sm:$0xff]  ;;  %v1785_v7 = vld [vmem:[%s3074_s0 + $0x138] sm:$0xf0]  ;;  %v2036_v9 = vld [vmem:[%s3074_s0 + $0x74] sm:$0xf0] }
  0x16   :  { %2120 = vmatpush.bf16.msra.mxu2 %v2071_v10  ;;  %696 = vmatpush.bf16.msra.mxu0 %v2071_v10  ;;  %v1783_v4 = vld [vmem:[%s3074_s0 + $0x120] sm:$0xf]  ;;  %v2057_v6 = vld [vmem:[%s3074_s0 + $0x124] sm:$0xf]  ;;  %v1807_v18 = vld [vmem:[%s3074_s0 + $0x150] sm:$0xf] }
  0x17   :  { %2128 = vmatpush.bf16.msra.mxu3 %v2079_v11  ;;  %745 = vmatpush.bf16.msra.mxu1 %v2079_v11  ;;  %v1687_v8 = vld [vmem:[%s3074_s0 + $0x60] sm:$0xf]  ;;  %v2033_v10 = vld [vmem:[%s3074_s0 + $0x64] sm:$0xf]  ;;  %v1689_v11 = vld [vmem:[%s3074_s0 + $0x78] sm:$0xf0] }
  0x18   :  { %v1692_v16 = vor.u32 %v2033_v10, %v1689_v11  ;;  %v2109_v17 = vld [vmem:[%s3073_s1 + $0x140] sm:$0xff]  ;;  %v2066_v19 = vld [vmem:[%s3074_s0 + $0x164] sm:$0xf0]  ;;  %v2063_v20 = vld [vmem:[%s3074_s0 + $0x154] sm:$0xf] }
  0x19   :  { %v1809_v21 = vld [vmem:[%s3074_s0 + $0x168] sm:$0xf0]  ;;  %v1711_v22 = vld [vmem:[%s3074_s0 + $0x90] sm:$0xf]  ;;  %v2042_v23 = vld [vmem:[%s3074_s0 + $0xa4] sm:$0xf0] }
  0x1a   :  { %2121 = vmatpush.bf16.msra.mxu2 %v2070_v12  ;;  %697 = vmatpush.bf16.msra.mxu0 %v2070_v12  ;;  %v2101_v12 = vld [vmem:[%s3073_s1 + $0x100] sm:$0xff]  ;;  %v2031_v43 = vld [vmem:[%s3074_s0 + $0x4c] sm:$0xf0]  ;;  %v2028_v44 = vld [vmem:[%s3074_s0 + $0x3c] sm:$0xf] }
  0x1b   :  { %2129 = vmatpush.bf16.msra.mxu3 %v2078_v13  ;;  %746 = vmatpush.bf16.msra.mxu1 %v2078_v13  ;;  %v1784_v13 = vor.u32 %v2060_v5, %v1783_v4  ;;  %v1673_v45 = vld [vmem:[%s3074_s0 + $0x50] sm:$0xf0]  ;;  %v1679_v46 = vld [vmem:[%s3074_s0 + $0x40] sm:$0xf]  ;;  %v2032_v47 = vld [vmem:[%s3074_s0 + $0x54] sm:$0xf0] }
  0x1c   :  { %v2029_v48 = vld [vmem:[%s3074_s0 + $0x44] sm:$0xf]  ;;  %v1681_v49 = vld [vmem:[%s3074_s0 + $0x58] sm:$0xf0]  ;;  %v1721_v5 = vld [vmem:[%s3074_s0 + $0xb0] sm:$0xf0] }
  0x1d   :  { %v2040_v4 = vld [vmem:[%s3074_s0 + $0x9c] sm:$0xf] }
  0x1e   :  { %2122 = vmatpush.bf16.msra.mxu2 %v2069_v14  ;;  %698 = vmatpush.bf16.msra.mxu0 %v2069_v14  ;;  %v1788_v14 = vor.u32 %v2057_v6, %v1785_v7  ;;  %v1727_v6 = vld [vmem:[%s3074_s0 + $0xa0] sm:$0xf]  ;;  %v2044_v7 = vld [vmem:[%s3074_s0 + $0xb4] sm:$0xf0]  ;;  %v1724_v11 = vor.u32 %v2040_v4, %v1721_v5 }
  0x1f   :  { %2130 = vmatpush.bf16.msra.mxu3 %v2077_v15  ;;  %747 = vmatpush.bf16.msra.mxu1 %v2077_v15  ;;  %v1688_v15 = vor.u32 %v2036_v9, %v1687_v8  ;;  %v2041_v8 = vld [vmem:[%s3074_s0 + $0xa4] sm:$0xf]  ;;  %v1729_v9 = vld [vmem:[%s3074_s0 + $0xb8] sm:$0xf0] }
  0x21   :  { %719 = vmatmul.bf16.vlgmr.msra.gmra.mxu2 %v1736_v26  ;;  %699 = vmatmul.bf16.vlgmr.msra.gmra.mxu0 %v1640_v28  ;;  %v1808_v26 = vor.u32 %v2066_v19, %v1807_v18  ;;  %v1712_v28 = vor.u32 %v2042_v23, %v1711_v22  ;;  %v1751_v18 = vld [vmem:[%s3074_s0 + $0xd0] sm:$0xf]  ;;  %v2050_v19 = vld [vmem:[%s3074_s0 + $0xe4] sm:$0xf0] }
  0x22   :  { %789 = vmatpush.bf16.msrb.mxu2 %v2092_v24  ;;  %768 = vmatmul.bf16.vlgmr.msra.gmra.mxu3 %v1740_v27  ;;  %v2039_v24 = vld [vmem:[%s3074_s0 + $0x94] sm:$0xf]  ;;  %v1812_v27 = vor.u32 %v2063_v20, %v1809_v21  ;;  %v1753_v21 = vld [vmem:[%s3074_s0 + $0xe8] sm:$0xf0] }
  0x23   :  { %838 = vmatpush.bf16.msrb.mxu3 %v2100_v25  ;;  %748 = vmatmul.bf16.vlgmr.msra.gmra.mxu1 %v1644_v29  ;;  %v1713_v25 = vld [vmem:[%s3074_s0 + $0xa8] sm:$0xf0]  ;;  %v2047_v20 = vld [vmem:[%s3074_s0 + $0xd4] sm:$0xf] }
  0x24   :  { %887 = vmatpush.bf16.msrb.mxu0 %v2108_v30  ;;  %938 = vmatpush.bf16.msrb.mxu1 %v2114_v31  ;;  %v1716_v29 = vor.u32 %v2039_v24, %v1713_v25  ;;  %v1647_v30 = vld [vmem:[%s3074_s0 + $0x8] sm:$0xf]  ;;  %v2025_v31 = vld [vmem:[%s3074_s0 + $0x1c] sm:$0xf0]  ;;  %v1752_v24 = vor.u32 %v2050_v19, %v1751_v18  ;;  %v1756_v25 = vor.u32 %v2047_v20, %v1753_v21  ;;  %v2068_v18 = vld [vmem:[%s3074_s0 + $0x174] sm:$0xf0] }
  0x25   :  { %v2065_v19 = vld [vmem:[%s3074_s0 + $0x164] sm:$0xf]  ;;  %v1825_v20 = vld [vmem:[%s3074_s0 + $0x178] sm:$0xf0] }
  0x26   :  { %790 = vmatpush.bf16.msrb.mxu2 %v2091_v32  ;;  %v2022_v32 = vld [vmem:[%s3074_s0 + $0xc] sm:$0xf] }
  0x27   :  { %839 = vmatpush.bf16.msrb.mxu3 %v2099_v33  ;;  %v1649_v33 = vld [vmem:[%s3074_s0 + $0x20] sm:$0xf0] }
  0x28   :  { %888 = vmatpush.bf16.msrb.mxu0 %v2107_v34  ;;  %939 = vmatpush.bf16.msrb.mxu1 %v2113_v35  ;;  %v1655_v34 = vld [vmem:[%s3074_s0 + $0x10] sm:$0xf]  ;;  %v2026_v35 = vld [vmem:[%s3074_s0 + $0x24] sm:$0xf0] }
  0x29   :  { %v1656_v40 = vor.u32 %v2026_v35, %v1655_v34  ;;  %v2055_v34 = vld [vmem:[%s3074_s0 + $0x10c] sm:$0xf0]  ;;  %v2052_v35 = vld [vmem:[%s3074_s0 + $0xfc] sm:$0xf] }
  0x2a   :  { %791 = vmatpush.bf16.msrb.mxu2 %v2090_v36  ;;  %v2023_v36 = vld [vmem:[%s3074_s0 + $0x14] sm:$0xf] }
  0x2b   :  { %840 = vmatpush.bf16.msrb.mxu3 %v2098_v37  ;;  %v1657_v37 = vld [vmem:[%s3074_s0 + $0x28] sm:$0xf0] }
  0x2c   :  { %889 = vmatpush.bf16.msrb.mxu0 %v2106_v38  ;;  %940 = vmatpush.bf16.msrb.mxu1 %v2112_v39  ;;  %v1648_v38 = vor.u32 %v2025_v31, %v1647_v30  ;;  %v1652_v39 = vor.u32 %v2022_v32, %v1649_v33  ;;  %v1767_v33 = vld [vmem:[%s3074_s0 + $0xf8] sm:$0xf] }
  0x2e   :  { %792 = vmatpush.bf16.msrb.mxu2 %v2089_v41  ;;  %v1660_v41 = vor.u32 %v2023_v36, %v1657_v37  ;;  %v1769_v36 = vld [vmem:[%s3074_s0 + $0x110] sm:$0xf0]  ;;  %v1775_v37 = vld [vmem:[%s3074_s0 + $0x100] sm:$0xf] }
  0x2f   :  { %841 = vmatpush.bf16.msrb.mxu3 %v2097_v42  ;;  %v1671_v42 = vld [vmem:[%s3074_s0 + $0x38] sm:$0xf] }
  0x30   :  { %890 = vmatpush.bf16.msrb.mxu0 %v2105_v50  ;;  %941 = vmatpush.bf16.msrb.mxu1 %v2111_v51  ;;  %v1672_v50 = vor.u32 %v2031_v43, %v1671_v42  ;;  %v1676_v51 = vor.u32 %v2028_v44, %v1673_v45  ;;  %v1768_v44 = vor.u32 %v2055_v34, %v1767_v33 }
  0x31   :  { %724 = vmatmul.bf16.gmra.mxu2 %v1760_v54  ;;  %704 = vmatmul.bf16.gmra.mxu0 %v1664_v56  ;;  %v1695_v54 = vld [vmem:[%s3074_s0 + $0x68] sm:$0xf]  ;;  %v2034_v56 = vld [vmem:[%s3074_s0 + $0x6c] sm:$0xf]  ;;  %v1772_v45 = vor.u32 %v2052_v35, %v1769_v36 }
  0x32   :  { %793 = vmatpush.bf16.msrb.mxu2 %v2088_v52  ;;  %773 = vmatmul.bf16.gmra.mxu3 %v1764_v55  ;;  %v1680_v52 = vor.u32 %v2032_v47, %v1679_v46  ;;  %v2037_v55 = vld [vmem:[%s3074_s0 + $0x7c] sm:$0xf0] }
  0x33   :  { %842 = vmatpush.bf16.msrb.mxu3 %v2096_v53  ;;  %753 = vmatmul.bf16.gmra.mxu1 %v1668_v57  ;;  %v1684_v53 = vor.u32 %v2029_v48, %v1681_v49  ;;  %v1697_v57 = vld [vmem:[%s3074_s0 + $0x80] sm:$0xf0] }
  0x34   :  { %891 = vmatpush.bf16.msrb.mxu0 %v2104_v58  ;;  %942 = vmatpush.bf16.msrb.mxu1 %v2110_v61  ;;  %v1703_v58 = vld [vmem:[%s3074_s0 + $0x70] sm:$0xf]  ;;  %v1705_v61 = vld [vmem:[%s3074_s0 + $0x88] sm:$0xf0] }
  0x36   :  { %794 = vmatpush.bf16.msrb.mxu2 %v2087_v59  ;;  %v2038_v59 = vld [vmem:[%s3074_s0 + $0x84] sm:$0xf0] }
  0x37   :  { %843 = vmatpush.bf16.msrb.mxu3 %v2095_v60  ;;  %v2035_v60 = vld [vmem:[%s3074_s0 + $0x74] sm:$0xf] }
  0x38   :  { %892 = vmatpush.bf16.msrb.mxu0 %v2103_v62  ;;  %943 = vmatpush.bf16.msrb.mxu1 %v2109_v17  ;;  %v1696_v62 = vor.u32 %v2037_v55, %v1695_v54  ;;  %v1745_v17 = vld [vmem:[%s3074_s0 + $0xe0] sm:$0xf0]  ;;  %v1791_v55 = vld [vmem:[%s3074_s0 + $0x128] sm:$0xf] }
  0x3a   :  { %795 = vmatpush.bf16.msrb.mxu2 %v2086_v63  ;;  %v1700_v63 = vor.u32 %v2034_v56, %v1697_v57  ;;  %v2061_v56 = vld [vmem:[%s3074_s0 + $0x13c] sm:$0xf0]  ;;  %v2058_v57 = vld [vmem:[%s3074_s0 + $0x12c] sm:$0xf] }
  0x3b   :  { %844 = vmatpush.bf16.msrb.mxu3 %v2094_v0  ;;  %v1704_v0 = vor.u32 %v2038_v59, %v1703_v58  ;;  %v1793_v58 = vld [vmem:[%s3074_s0 + $0x140] sm:$0xf0]  ;;  %v1799_v59 = vld [vmem:[%s3074_s0 + $0x130] sm:$0xf] }
  0x3c   :  { %893 = vmatpush.bf16.msrb.mxu0 %v2102_v1  ;;  %v1708_v1 = vor.u32 %v2035_v60, %v1705_v61  ;;  %v2062_v60 = vld [vmem:[%s3074_s0 + $0x144] sm:$0xf0]  ;;  %v2059_v61 = vld [vmem:[%s3074_s0 + $0x134] sm:$0xf] }
  0x3d   :  { %v1800_v4 = vor.u32 %v2062_v60, %v1799_v59 }
  0x3e   :  { %796 = vmatpush.bf16.msrb.mxu2 %v2085_v2  ;;  %v1719_v2 = vld [vmem:[%s3074_s0 + $0x98] sm:$0xf] }
  0x3f   :  { %845 = vmatpush.bf16.msrb.mxu3 %v2093_v3  ;;  %v2043_v3 = vld [vmem:[%s3074_s0 + $0xac] sm:$0xf0] }
  0x40   :  { %894 = vmatpush.bf16.msrb.mxu0 %v2101_v12  ;;  %v1720_v10 = vor.u32 %v2043_v3, %v1719_v2  ;;  %v1728_v12 = vor.u32 %v2044_v7, %v1727_v6  ;;  %v1792_v2 = vor.u32 %v2061_v56, %v1791_v55  ;;  %v1796_v3 = vor.u32 %v2058_v57, %v1793_v58 }
  0x41   :  { %729 = vmatmul.bf16.gmra.mxu2 %v1784_v13  ;;  %709 = vmatmul.bf16.gmra.mxu0 %v1688_v15  ;;  %v1732_v13 = vor.u32 %v2041_v8, %v1729_v9  ;;  %v2049_v15 = vld [vmem:[%s3074_s0 + $0xdc] sm:$0xf0] }
  0x42   :  { %778 = vmatmul.bf16.gmra.mxu3 %v1788_v14  ;;  %v1743_v14 = vld [vmem:[%s3074_s0 + $0xc8] sm:$0xf] }
  0x43   :  { %758 = vmatmul.bf16.gmra.mxu1 %v1692_v16  ;;  %v2046_v16 = vld [vmem:[%s3074_s0 + $0xcc] sm:$0xf]  ;;  %v1744_v22 = vor.u32 %v2049_v15, %v1743_v14  ;;  %v2067_v14 = vld [vmem:[%s3074_s0 + $0x16c] sm:$0xf0]  ;;  %v2064_v15 = vld [vmem:[%s3074_s0 + $0x15c] sm:$0xf] }
  0x44   :  { %v1748_v23 = vor.u32 %v2046_v16, %v1745_v17  ;;  %v1817_v16 = vld [vmem:[%s3074_s0 + $0x170] sm:$0xf0]  ;;  %v1823_v17 = vld [vmem:[%s3074_s0 + $0x160] sm:$0xf] }
  0x51   :  { %734 = vmatmul.bf16.gmra.mxu2 %v1808_v26  ;;  %714 = vmatmul.bf16.gmra.mxu0 %v1712_v28 }
  0x52   :  { %783 = vmatmul.bf16.gmra.mxu3 %v1812_v27 }
  0x53   :  { %763 = vmatmul.bf16.gmra.mxu1 %v1716_v29 }
  0x61   :  { %797 = vmatmul.bf16.vlgmr.msrb.gmra.mxu2 %v1648_v38  ;;  %895 = vmatmul.bf16.vlgmr.msrb.gmra.mxu0 %v1656_v40  ;;  %v2056_v38 = vld [vmem:[%s3074_s0 + $0x114] sm:$0xf0]  ;;  %v1777_v40 = vld [vmem:[%s3074_s0 + $0x118] sm:$0xf0] }
  0x62   :  { %846 = vmatmul.bf16.vlgmr.msrb.gmra.mxu3 %v1652_v39  ;;  %v2053_v39 = vld [vmem:[%s3074_s0 + $0x104] sm:$0xf]  ;;  %v1776_v46 = vor.u32 %v2056_v38, %v1775_v37 }
  0x63   :  { %2013 = vmatmul.msk.bf16.vlgmr.msrb.gmra.mxu1 %vm666_vm0, %v1660_v41  ;;  %v1780_v47 = vor.u32 %v2053_v39, %v1777_v40 }
  0x71   :  { %802 = vmatmul.bf16.gmra.mxu2 %v1672_v50  ;;  %900 = vmatmul.bf16.gmra.mxu0 %v1680_v52 }
  0x72   :  { %851 = vmatmul.bf16.gmra.mxu3 %v1676_v51 }
  0x73   :  { %2014 = vmatmul.msk.bf16.gmra.mxu1 %vm666_vm0, %v1684_v53 }
  0x81   :  { %807 = vmatmul.bf16.gmra.mxu2 %v1696_v62  ;;  %905 = vmatmul.bf16.gmra.mxu0 %v1704_v0  ;;  %v1801_v62 = vld [vmem:[%s3074_s0 + $0x148] sm:$0xf0] }
  0x82   :  { %856 = vmatmul.bf16.gmra.mxu3 %v1700_v63  ;;  %v1804_v5 = vor.u32 %v2059_v61, %v1801_v62 }
  0x83   :  { %2015 = vmatmul.msk.bf16.gmra.mxu1 %vm666_vm0, %v1708_v1 }
  0x91   :  { %812 = vmatmul.bf16.gmra.mxu2 %v1720_v10  ;;  %910 = vmatmul.bf16.gmra.mxu0 %v1728_v12 }
  0x92   :  { %861 = vmatmul.bf16.gmra.mxu3 %v1724_v11 }
  0x93   :  { %2016 = vmatmul.msk.bf16.gmra.mxu1 %vm666_vm0, %v1732_v13  ;;  %v1815_v13 = vld [vmem:[%s3074_s0 + $0x158] sm:$0xf] }
  0x9e   :  { %v2555_v26 = vpop.f32.mrf.mxu0 }
  0xa0   :  { %v2557_v27 = vpop.f32.mrf.mxu1 }
  0xa1   :  { %817 = vmatmul.bf16.gmra.mxu2 %v1744_v22  ;;  %915 = vmatmul.bf16.gmra.mxu0 %v1752_v24  ;;  %v1816_v24 = vor.u32 %v2067_v14, %v1815_v13 }
  0xa2   :  { %866 = vmatmul.bf16.gmra.mxu3 %v1748_v23 }
  0xa3   :  { %2017 = vmatmul.msk.bf16.gmra.mxu1 %vm666_vm0, %v1756_v25  ;;  %v1820_v25 = vor.u32 %v2064_v15, %v1817_v16 }
  0xa4   :  { %v720_v28 = vpop.f32.mrf.mxu2 }
  0xa5   :  { %v769_v29 = vpop.f32.mrf.mxu3 }
  0xa6   :  { %v2560_v30 = vadd.f32 %v769_v29, %v720_v28  ;;  %v2562_v31 = vpop.f32.mrf.mxu0  ;;  %v1824_v28 = vor.u32 %v2068_v18, %v1823_v17  ;;  %v1828_v29 = vor.u32 %v2065_v19, %v1825_v20 }
  0xa8   :  { %v2564_v32 = vpop.f32.mrf.mxu1 }
  0xa9   :  { %v752_v59 = vadd.f32 %v2564_v32, %v2562_v31 }
  0xac   :  { %v722_v41 = vpop.f32.mrf.mxu2 }
  0xad   :  { %v771_v42 = vpop.f32.mrf.mxu3 }
  0xae   :  { %v2590_v43 = vadd.f32 %v771_v42, %v722_v41  ;;  %v2592_v48 = vpop.f32.mrf.mxu0 }
  0xb0   :  { %v2594_v49 = vpop.f32.mrf.mxu1 }
  0xb1   :  { %822 = vmatmul.bf16.gmra.mxu2 %v1768_v44  ;;  %920 = vmatmul.bf16.gmra.mxu0 %v1776_v46  ;;  %v750_v46 = vadd.f32 %v2557_v27, %v2555_v26 }
  0xb2   :  { %871 = vmatmul.bf16.gmra.mxu3 %v1772_v45 }
  0xb3   :  { %2018 = vmatmul.msk.bf16.gmra.mxu1 %vm666_vm0, %v1780_v47 }
  0xb4   :  { %v725_v50 = vpop.f32.mrf.mxu2 }
  0xb5   :  { %v774_v51 = vpop.f32.mrf.mxu3 }
  0xb6   :  { %v2597_v52 = vadd.f32 %v774_v51, %v725_v50  ;;  %v2599_v53 = vpop.f32.mrf.mxu0 }
  0xb8   :  { %v2601_v54 = vpop.f32.mrf.mxu1 }
  0xb9   :  { %v757_v17 = vadd.f32 %v2601_v54, %v2599_v53 }
  0xbc   :  { %v727_v63 = vpop.f32.mrf.mxu2 }
  0xbd   :  { %v776_v0 = vpop.f32.mrf.mxu3 }
  0xbe   :  { %v2627_v1 = vadd.f32 %v776_v0, %v727_v63  ;;  %v2629_v6 = vpop.f32.mrf.mxu0 }
  0xc0   :  { %v2631_v7 = vpop.f32.mrf.mxu1 }
  0xc1   :  { %827 = vmatmul.bf16.gmra.mxu2 %v1792_v2  ;;  %925 = vmatmul.bf16.gmra.mxu0 %v1800_v4  ;;  %v755_v4 = vadd.f32 %v2594_v49, %v2592_v48 }
  0xc2   :  { %876 = vmatmul.bf16.gmra.mxu3 %v1796_v3 }
  0xc3   :  { %2019 = vmatmul.msk.bf16.gmra.mxu1 %vm666_vm0, %v1804_v5 }
  0xc4   :  { %v730_v8 = vpop.f32.mrf.mxu2 }
  0xc5   :  { %v779_v9 = vpop.f32.mrf.mxu3 }
  0xc6   :  { %v2634_v10 = vadd.f32 %v779_v9, %v730_v8  ;;  %v2636_v11 = vpop.f32.mrf.mxu0 }
  0xc8   :  { %v2638_v12 = vpop.f32.mrf.mxu1 }
  0xcc   :  { %v732_v21 = vpop.f32.mrf.mxu2 }
  0xcd   :  { %v781_v22 = vpop.f32.mrf.mxu3 }
  0xce   :  { %v2664_v23 = vadd.f32 %v781_v22, %v732_v21  ;;  %v2666_v33 = vpop.f32.mrf.mxu0 }
  0xd0   :  { %v2668_v34 = vpop.f32.mrf.mxu1 }
  0xd1   :  { %832 = vmatmul.bf16.gmra.mxu2 %v1816_v24  ;;  %930 = vmatmul.bf16.gmra.mxu0 %v1824_v28  ;;  %v760_v28 = vadd.f32 %v2631_v7, %v2629_v6 }
  0xd2   :  { %881 = vmatmul.bf16.gmra.mxu3 %v1820_v25 }
  0xd3   :  { %2020 = vmatmul.msk.bf16.gmra.mxu1 %vm666_vm0, %v1828_v29 }
  0xd4   :  { %v735_v35 = vpop.f32.mrf.mxu2 }
  0xd5   :  { %v784_v36 = vpop.f32.mrf.mxu3 }
  0xd6   :  { %v2671_v37 = vadd.f32 %v784_v36, %v735_v35  ;;  %v2673_v38 = vpop.f32.mrf.mxu0 }
  0xd8   :  { %v2675_v39 = vpop.f32.mrf.mxu1 }
  0xdc   :  { %v737_v40 = vpop.f32.mrf.mxu2 }
  0xdd   :  { %v786_v41 = vpop.f32.mrf.mxu3 }
  0xde   :  { %v2677_v42 = vadd.f32 %v786_v41, %v737_v40  ;;  %v896_v44 = vpop.f32.mrf.mxu0 }
  0xe0   :  { %v945_v45 = vpop.f32.mrf.mxu1 }
  0xe4   :  { %v798_v47 = vpop.f32.mrf.mxu2 }
  0xe5   :  { %v847_v50 = vpop.f32.mrf.mxu3  ;;  %v799_v51 = vadd.f32 %v798_v47, %v750_v46  ;;  %v762_v46 = vadd.f32 %v2638_v12, %v2636_v11 }
  0xe6   :  { %v898_v56 = vpop.f32.mrf.mxu0 }
  0xe7   :  { %v848_v55 = vadd.f32 %v847_v50, %v799_v51 }
  0xe8   :  { %v947_v57 = vpop.f32.mrf.mxu1 }
  0xe9   :  { %v897_v58 = vadd.f32 %v896_v44, %v848_v55 }
  0xeb   :  { %v2683_v60 = vadd.f32 %v945_v45, %v897_v58 }
  0xec   :  { %v800_v61 = vpop.f32.mrf.mxu2 }
  0xed   :  { %v849_v62 = vpop.f32.mrf.mxu3  ;;  %v801_v63 = vadd.f32 %v800_v61, %v752_v59  ;;  %v986_v0 = vsel %vm985_vm1, %v2683_v60, 0.0  ;;  %v765_v59 = vadd.f32 %v2668_v34, %v2666_v33 }
  0xee   :  { %987 = vadd.xlane.f32.xlu0 %v986_v0  ;;  %v901_v27 = vpop.f32.mrf.mxu0 }
  0xef   :  { %v850_v26 = vadd.f32 %v849_v62, %v801_v63 }
  0xf0   :  { %v950_v2 = vpop.f32.mrf.mxu1 }
  0xf1   :  { %v899_v3 = vadd.f32 %v898_v56, %v850_v26 }
  0xf3   :  { %v2689_v5 = vadd.f32 %v947_v57, %v899_v3  ;;  %v767_v3 = vadd.f32 %v2675_v39, %v2673_v38 }
  0xf4   :  { %v803_v8 = vpop.f32.mrf.mxu2 }
  0xf5   :  { %v852_v31 = vpop.f32.mrf.mxu3  ;;  %v804_v32 = vadd.f32 %v803_v8, %v755_v4  ;;  %v989_v9 = vsel %vm985_vm1, %v2689_v5, 0.0 }
  0xf6   :  { %990 = vadd.xlane.f32.xlu0 %v989_v9  ;;  %v903_v14 = vpop.f32.mrf.mxu0 }
  0xf7   :  { %v853_v13 = vadd.f32 %v852_v31, %v804_v32 }
  0xf8   :  { %v952_v15 = vpop.f32.mrf.mxu1 }
  0xf9   :  { %v902_v16 = vadd.f32 %v901_v27, %v853_v13 }
  0xfb   :  { %v2695_v18 = vadd.f32 %v950_v2, %v902_v16 }
  0xfc   :  { %v805_v19 = vpop.f32.mrf.mxu2 }
  0xfd   :  { %v854_v48 = vpop.f32.mrf.mxu3  ;;  %v806_v49 = vadd.f32 %v805_v19, %v757_v17  ;;  %v992_v20 = vsel %vm985_vm1, %v2695_v18, 0.0 }
  0xfe   :  { %993 = vadd.xlane.f32.xlu1 %v992_v20  ;;  %v906_v22 = vpop.f32.mrf.mxu0 }
  0xff   :  { %v855_v21 = vadd.f32 %v854_v48, %v806_v49 }
 0x100   :  { %v955_v24 = vpop.f32.mrf.mxu1 }
 0x101   :  { %v904_v25 = vadd.f32 %v903_v14, %v855_v21 }
 0x103   :  { %v2701_v29 = vadd.f32 %v952_v15, %v904_v25 }
 0x104   :  { %v808_v35 = vpop.f32.mrf.mxu2 }
 0x105   :  { %v857_v53 = vpop.f32.mrf.mxu3  ;;  %v809_v54 = vadd.f32 %v808_v35, %v760_v28  ;;  %v995_v36 = vsel %vm985_vm1, %v2701_v29, 0.0 }
 0x106   :  { %996 = vadd.xlane.f32.xlu1 %v995_v36  ;;  %v908_v41 = vpop.f32.mrf.mxu0 }
 0x107   :  { %v858_v40 = vadd.f32 %v857_v53, %v809_v54 }
 0x108   :  { %v957_v44 = vpop.f32.mrf.mxu1 }
 0x109   :  { %v907_v45 = vadd.f32 %v906_v22, %v858_v40 }
 0x10b   :  { %v2707_v47 = vadd.f32 %v955_v24, %v907_v45 }
 0x10c   :  { %v810_v50 = vpop.f32.mrf.mxu2 }
 0x10d   :  { %v859_v6 = vpop.f32.mrf.mxu3  ;;  %v811_v7 = vadd.f32 %v810_v50, %v762_v46  ;;  %v998_v51 = vsel %vm985_vm1, %v2707_v47, 0.0 }
 0x10e   :  { %999 = vadd.xlane.f32.xlu2 %v998_v51  ;;  %v911_v56 = vpop.f32.mrf.mxu0 }
 0x10f   :  { %v860_v55 = vadd.f32 %v859_v6, %v811_v7 }
 0x110   :  { %v960_v57 = vpop.f32.mrf.mxu1 }
 0x111   :  { %v909_v58 = vadd.f32 %v908_v41, %v860_v55 }
 0x113   :  { %v2713_v61 = vadd.f32 %v957_v44, %v909_v58 }
 0x114   :  { %v813_v62 = vpop.f32.mrf.mxu2 }
 0x115   :  { %v862_v11 = vpop.f32.mrf.mxu3  ;;  %v814_v12 = vadd.f32 %v813_v62, %v765_v59  ;;  %v1001_v63 = vsel %vm985_vm1, %v2713_v61, 0.0 }
 0x116   :  { %1002 = vadd.xlane.f32.xlu2 %v1001_v63  ;;  %v913_v26 = vpop.f32.mrf.mxu0 }
 0x117   :  { %v863_v0 = vadd.f32 %v862_v11, %v814_v12 }
 0x118   :  { %v962_v27 = vpop.f32.mrf.mxu1 }
 0x119   :  { %v912_v2 = vadd.f32 %v911_v56, %v863_v0 }
 0x11b   :  { %v2719_v4 = vadd.f32 %v960_v57, %v912_v2 }
 0x11c   :  { %v815_v8 = vpop.f32.mrf.mxu2 }
 0x11d   :  { %v864_v33 = vpop.f32.mrf.mxu3  ;;  %v816_v34 = vadd.f32 %v815_v8, %v767_v3  ;;  %v1004_v31 = vsel %vm985_vm1, %v2719_v4, 0.0 }
 0x11e   :  { %1005 = vadd.xlane.f32.xlu0 %v1004_v31  ;;  %v916_v9 = vpop.f32.mrf.mxu0 }
 0x11f   :  { %v865_v32 = vadd.f32 %v864_v33, %v816_v34 }
 0x120   :  { %v965_v13 = vpop.f32.mrf.mxu1 }
 0x121   :  { %v914_v14 = vadd.f32 %v913_v26, %v865_v32 }
 0x123   :  { %v2723_v15 = vadd.f32 %v962_v27, %v914_v14  ;;  %v2170_v27 = vmov 49.0  }
 0x124   :  { %v818_v16 = vpop.f32.mrf.mxu2  ;;  %2136 = vrcp.f32 %v2170_v27 }
 0x125   :  { %v867_v17 = vpop.f32.mrf.mxu3  ;;  %v819_v19 = vadd.f32 %v818_v16, %v2560_v30  ;;  %v1007_v38 = vsel %vm985_vm1, %v2723_v15, 0.0 }
 0x126   :  { %1008 = vadd.xlane.f32.xlu1 %v1007_v38  ;;  %v918_v48 = vpop.f32.mrf.mxu0 }
 0x127   :  { %v868_v39 = vadd.f32 %v867_v17, %v819_v19 }
 0x128   :  { %v967_v49 = vpop.f32.mrf.mxu1 }
 0x129   :  { %v917_v20 = vadd.f32 %v916_v9, %v868_v39 }
 0x12a   :  { %v2137_v33 = vpop.eup %2136 }
 0x12b   :  { %v2728_v21 = vadd.f32 %v965_v13, %v917_v20  ;;  %v1035_v14 = vmul.f32 49.0, %v2137_v33  ;;  %vm1039_vm2 = vweird.f32 %v2137_v33 }
 0x12c   :  { %v820_v22 = vpop.f32.mrf.mxu2 }
 0x12d   :  { %v869_v24 = vpop.f32.mrf.mxu3  ;;  %v821_v25 = vadd.f32 %v820_v22, %v2590_v43  ;;  %v1010_v28 = vsel %vm985_vm1, %v2728_v21, 0.0  ;;  %v1036_v19 = vsub.f32 1.0, %v1035_v14 }
 0x12e   :  { %1011 = vadd.xlane.f32.xlu2 %v1010_v28  ;;  %v921_v30 = vpop.f32.mrf.mxu0 }
 0x12f   :  { %v870_v35 = vadd.f32 %v869_v24, %v821_v25  ;;  %v1037_v22 = vmul.f32 %v2137_v33, %v1036_v19 }
 0x130   :  { %v970_v53 = vpop.f32.mrf.mxu1 }
 0x131   :  { %v919_v54 = vadd.f32 %v918_v48, %v870_v35  ;;  %v1038_v35 = vadd.f32 %v2137_v33, %v1037_v22 }
 0x133   :  { %v2733_v36 = vadd.f32 %v967_v49, %v919_v54 }
 0x134   :  { %v823_v40 = vpop.f32.mrf.mxu2 }
 0x135   :  { %v872_v41 = vpop.f32.mrf.mxu3  ;;  %v824_v44 = vadd.f32 %v823_v40, %v2597_v52  ;;  %v1013_v45 = vsel %vm985_vm1, %v2733_v36, 0.0 }
 0x136   :  { %1014 = vadd.xlane.f32.xlu0 %v1013_v45  ;;  %v923_v43 = vpop.f32.mrf.mxu0 }
 0x137   :  { %v873_v46 = vadd.f32 %v872_v41, %v824_v44  ;;  %v2763_v41 = vsel %vm1039_vm2, %v2137_v33, %v1038_v35 }
 0x138   :  { %v972_v6 = vpop.f32.mrf.mxu1 }
 0x139   :  { %v922_v50 = vadd.f32 %v921_v30, %v873_v46 }
 0x13b   :  { %v2738_v7 = vadd.f32 %v970_v53, %v922_v50 }
 0x13c   :  { %v825_v51 = vpop.f32.mrf.mxu2 }
 0x13d   :  { %v874_v55 = vpop.f32.mrf.mxu3  ;;  %v826_v56 = vadd.f32 %v825_v51, %v2627_v1  ;;  %v1016_v57 = vsel %vm985_vm1, %v2738_v7, 0.0 }
 0x13e   :  { %1017 = vadd.xlane.f32.xlu1 %v1016_v57  ;;  %v926_v59 = vpop.f32.mrf.mxu0 }
 0x13f   :  { %v875_v58 = vadd.f32 %v874_v55, %v826_v56 }
 0x140   :  { %v975_v11 = vpop.f32.mrf.mxu1 }
 0x141   :  { %v924_v52 = vadd.f32 %v923_v43, %v875_v58 }
 0x143   :  { %v2743_v62 = vadd.f32 %v972_v6, %v924_v52 }
 0x144   :  { %v828_v12 = vpop.f32.mrf.mxu2 }
 0x145   :  { %v877_v63 = vpop.f32.mrf.mxu3  ;;  %v829_v0 = vadd.f32 %v828_v12, %v2634_v10  ;;  %v1019_v26 = vsel %vm985_vm1, %v2743_v62, 0.0 }
 0x146   :  { %1020 = vadd.xlane.f32.xlu2 %v1019_v26  ;;  %v928_v8 = vpop.f32.mrf.mxu0 }
 0x147   :  { %v878_v1 = vadd.f32 %v877_v63, %v829_v0 }
 0x148   :  { %v977_v10 = vpop.f32.mrf.mxu1 }
 0x149   :  { %v927_v2 = vadd.f32 %v926_v59, %v878_v1 }
 0x14b   :  { %v2748_v3 = vadd.f32 %v975_v11, %v927_v2 }
 0x14c   :  { %v830_v34 = vpop.f32.mrf.mxu2 }
 0x14d   :  { %v879_v31 = vpop.f32.mrf.mxu3  ;;  %v831_v32 = vadd.f32 %v830_v34, %v2664_v23  ;;  %v1022_v9 = vsel %vm985_vm1, %v2748_v3, 0.0 }
 0x14e   :  { %1023 = vadd.xlane.f32.xlu0 %v1022_v9  ;;  %v931_v20 = vpop.f32.mrf.mxu0 }
 0x14f   :  { %v880_v13 = vadd.f32 %v879_v31, %v831_v32 }
 0x150   :  { %v980_v24 = vpop.f32.mrf.mxu1 }
 0x151   :  { %v929_v16 = vadd.f32 %v928_v8, %v880_v13 }
 0x153   :  { %v2753_v17 = vadd.f32 %v977_v10, %v929_v16 }
 0x154   :  { %v833_v38 = vpop.f32.mrf.mxu2 }
 0x155   :  { %v882_v39 = vpop.f32.mrf.mxu3  ;;  %v834_v48 = vadd.f32 %v833_v38, %v2671_v37  ;;  %v1025_v49 = vsel %vm985_vm1, %v2753_v17, 0.0 }
 0x156   :  { %1026 = vadd.xlane.f32.xlu1 %v1025_v49  ;;  %v933_v44 = vpop.f32.mrf.mxu0 }
 0x157   :  { %v883_v23 = vadd.f32 %v882_v39, %v834_v48 }
 0x158   :  { %v982_v43 = vpop.f32.mrf.mxu1 }
 0x159   :  { %v932_v25 = vadd.f32 %v931_v20, %v883_v23 }
 0x15b   :  { %v2758_v28 = vadd.f32 %v980_v24, %v932_v25 }
 0x15c   :  { %v835_v30 = vpop.f32.mrf.mxu2 }
 0x15d   :  { %v836_v53 = vadd.f32 %v835_v30, %v2677_v42  ;;  %v1028_v54 = vsel %vm985_vm1, %v2758_v28, 0.0  ;;  %v884_v37 = vpop.f32.mrf.mxu3 }
 0x15e   :  { %1029 = vadd.xlane.f32.xlu2 %v1028_v54 }
 0x15f   :  { %v885_v40 = vadd.f32 %v884_v37, %v836_v53 }
 0x161   :  { %v934_v45 = vadd.f32 %v933_v44, %v885_v40  ;;  %v988_v46 = vpop.xlane.xlu0 %987 }
 0x162   :  { %v2766_v50 = vmul.f32 %v2763_v41, %v988_v46 }
 0x163   :  { %v2768_v6 = vadd.f32 %v982_v43, %v934_v45 }
 0x164   :  { %v1057_v42 = vsub.f32 %v2683_v60, %v2766_v50 }
 0x165   :  { %v1031_v51 = vsel %vm985_vm1, %v2768_v6, 0.0 }
 0x166   :  { %1032 = vadd.xlane.f32.xlu0 %v1031_v51  ;;  %v1073_v55 = vmul.f32 %v1057_v42, %v1057_v42 }
 0x168   :  { %v1089_v56 = vsel %vm985_vm1, %v1073_v55, 0.0 }
 0x169   :  { %1090 = vadd.xlane.f32.xlu1 %v1089_v56  ;;  %v991_v57 = vpop.xlane.xlu0 %990 }
 0x16a   :  { %v2776_v58 = vmul.f32 %v2763_v41, %v991_v57 }
 0x16c   :  { %v1058_v52 = vsub.f32 %v2689_v5, %v2776_v58 }
 0x16e   :  { %v1074_v59 = vmul.f32 %v1058_v52, %v1058_v52 }
 0x170   :  { %v1092_v11 = vsel %vm985_vm1, %v1074_v59, 0.0 }
 0x171   :  { %v994_v12 = vpop.xlane.xlu1 %993  ;;  %1093 = vadd.xlane.f32.xlu2 %v1092_v11 }
 0x172   :  { %v2782_v63 = vmul.f32 %v2763_v41, %v994_v12 }
 0x174   :  { %v1059_v0 = vsub.f32 %v2695_v18, %v2782_v63 }
 0x176   :  { %v1075_v26 = vmul.f32 %v1059_v0, %v1059_v0 }
 0x178   :  { %v1095_v27 = vsel %vm985_vm1, %v1075_v26, 0.0 }
 0x179   :  { %v997_v1 = vpop.xlane.xlu1 %996  ;;  %1096 = vadd.xlane.f32.xlu0 %v1095_v27 }
 0x17a   :  { %v2788_v2 = vmul.f32 %v2763_v41, %v997_v1 }
 0x17c   :  { %v1060_v8 = vsub.f32 %v2701_v29, %v2788_v2 }
 0x17e   :  { %v1076_v33 = vmul.f32 %v1060_v8, %v1060_v8 }
 0x180   :  { %v1098_v34 = vsel %vm985_vm1, %v1076_v33, 0.0 }
 0x181   :  { %v1000_v31 = vpop.xlane.xlu2 %999  ;;  %1099 = vadd.xlane.f32.xlu1 %v1098_v34 }
 0x182   :  { %v2794_v32 = vmul.f32 %v2763_v41, %v1000_v31 }
 0x184   :  { %v1061_v9 = vsub.f32 %v2707_v47, %v2794_v32 }
 0x186   :  { %v1077_v10 = vmul.f32 %v1061_v9, %v1061_v9 }
 0x188   :  { %v1101_v13 = vsel %vm985_vm1, %v1077_v10, 0.0 }
 0x189   :  { %v1003_v14 = vpop.xlane.xlu2 %1002  ;;  %1102 = vadd.xlane.f32.xlu2 %v1101_v13 }
 0x18a   :  { %v2800_v16 = vmul.f32 %v2763_v41, %v1003_v14 }
 0x18c   :  { %v1062_v19 = vsub.f32 %v2713_v61, %v2800_v16 }
 0x18e   :  { %v1078_v38 = vmul.f32 %v1062_v19, %v1062_v19 }
 0x190   :  { %v1104_v39 = vsel %vm985_vm1, %v1078_v38, 0.0 }
 0x191   :  { %1105 = vadd.xlane.f32.xlu0 %v1104_v39  ;;  %v1006_v48 = vpop.xlane.xlu0 %1005 }
 0x192   :  { %v2806_v49 = vmul.f32 %v2763_v41, %v1006_v48 }
 0x194   :  { %v1063_v20 = vsub.f32 %v2719_v4, %v2806_v49 }
 0x196   :  { %v1079_v23 = vmul.f32 %v1063_v20, %v1063_v20 }
 0x198   :  { %v1107_v22 = vsel %vm985_vm1, %v1079_v23, 0.0  ;;  %v2171_v23 = vmov 0  }
 0x199   :  { %v1009_v24 = vpop.xlane.xlu1 %1008  ;;  %1108 = vadd.xlane.f32.xlu1 %v1107_v22  ;;  %2133 = vset.pattern.permute.xlu2 %v2171_v23 }
 0x19a   :  { %v2812_v25 = vmul.f32 %v2763_v41, %v1009_v24  ;;  %2134 = vset.pattern.permute.xlu1 %v2171_v23  ;;  %2135 = vset.pattern.permute.xlu0 %v2171_v23 }
 0x19c   :  { %v1064_v35 = vsub.f32 %v2723_v15, %v2812_v25 }
 0x19e   :  { %v1080_v30 = vmul.f32 %v1064_v35, %v1064_v35 }
 0x1a0   :  { %v1110_v53 = vsel %vm985_vm1, %v1080_v30, 0.0 }
 0x1a1   :  { %v1012_v54 = vpop.xlane.xlu2 %1011  ;;  %1111 = vadd.xlane.f32.xlu2 %v1110_v53 }
 0x1a2   :  { %v2818_v37 = vmul.f32 %v2763_v41, %v1012_v54 }
 0x1a4   :  { %v1065_v40 = vsub.f32 %v2728_v21, %v2818_v37 }
 0x1a6   :  { %v1081_v44 = vmul.f32 %v1065_v40, %v1065_v40 }
 0x1a8   :  { %v1113_v45 = vsel %vm985_vm1, %v1081_v44, 0.0 }
 0x1a9   :  { %1114 = vadd.xlane.f32.xlu0 %v1113_v45  ;;  %v1015_v46 = vpop.xlane.xlu0 %1014 }
 0x1aa   :  { %v2824_v43 = vmul.f32 %v2763_v41, %v1015_v46 }
 0x1ac   :  { %v1066_v42 = vsub.f32 %v2733_v36, %v2824_v43 }
 0x1ae   :  { %v1082_v51 = vmul.f32 %v1066_v42, %v1066_v42 }
 0x1b0   :  { %v1116_v55 = vsel %vm985_vm1, %v1082_v51, 0.0 }
 0x1b1   :  { %v1018_v56 = vpop.xlane.xlu1 %1017  ;;  %1117 = vadd.xlane.f32.xlu1 %v1116_v55 }
 0x1b2   :  { %v2830_v57 = vmul.f32 %v2763_v41, %v1018_v56 }
 0x1b4   :  { %v1067_v52 = vsub.f32 %v2738_v7, %v2830_v57 }
 0x1b6   :  { %v1083_v59 = vmul.f32 %v1067_v52, %v1067_v52 }
 0x1b8   :  { %v1119_v11 = vsel %vm985_vm1, %v1083_v59, 0.0 }
 0x1b9   :  { %v1021_v12 = vpop.xlane.xlu2 %1020  ;;  %1120 = vadd.xlane.f32.xlu2 %v1119_v11 }
 0x1ba   :  { %v2836_v0 = vmul.f32 %v2763_v41, %v1021_v12 }
 0x1bc   :  { %v1068_v26 = vsub.f32 %v2743_v62, %v2836_v0 }
 0x1be   :  { %v1084_v27 = vmul.f32 %v1068_v26, %v1068_v26 }
 0x1c0   :  { %v1122_v1 = vsel %vm985_vm1, %v1084_v27, 0.0 }
 0x1c1   :  { %1123 = vadd.xlane.f32.xlu0 %v1122_v1  ;;  %v1024_v8 = vpop.xlane.xlu0 %1023 }
 0x1c2   :  { %v2842_v33 = vmul.f32 %v2763_v41, %v1024_v8 }
 0x1c4   :  { %v1069_v34 = vsub.f32 %v2748_v3, %v2842_v33 }
 0x1c6   :  { %v1085_v31 = vmul.f32 %v1069_v34, %v1069_v34 }
 0x1c8   :  { %v1125_v9 = vsel %vm985_vm1, %v1085_v31, 0.0  ;;  %v1153_v31 = vld [vmem:[%s3075_s2] sm:$0xff] }
 0x1c9   :  { %v1027_v10 = vpop.xlane.xlu1 %1026  ;;  %1126 = vadd.xlane.f32.xlu1 %v1125_v9 }
 0x1ca   :  { %v2848_v13 = vmul.f32 %v2763_v41, %v1027_v10 }
 0x1cc   :  { %v1070_v14 = vsub.f32 %v2753_v17, %v2848_v13 }
 0x1ce   :  { %v1086_v19 = vmul.f32 %v1070_v14, %v1070_v14 }
 0x1d0   :  { %v1128_v38 = vsel %vm985_vm1, %v1086_v19, 0.0 }
 0x1d1   :  { %v1030_v39 = vpop.xlane.xlu2 %1029  ;;  %1129 = vadd.xlane.f32.xlu2 %v1128_v38 }
 0x1d2   :  { %v2854_v48 = vmul.f32 %v2763_v41, %v1030_v39 }
 0x1d4   :  { %v1071_v20 = vsub.f32 %v2758_v28, %v2854_v48 }
 0x1d6   :  { %v1087_v22 = vmul.f32 %v1071_v20, %v1071_v20  ;;  %v1361_v20 = vld [vmem:[%s3076_s3] sm:$0xff] }
 0x1d8   :  { %v1131_v24 = vsel %vm985_vm1, %v1087_v22, 0.0 }
 0x1d9   :  { %1132 = vadd.xlane.f32.xlu0 %v1131_v24  ;;  %v1033_v35 = vpop.xlane.xlu0 %1032 }
 0x1da   :  { %v2860_v30 = vmul.f32 %v2763_v41, %v1033_v35 }
 0x1dc   :  { %v1072_v53 = vsub.f32 %v2768_v6, %v2860_v30  ;;  %v1091_v54 = vpop.xlane.xlu1 %1090 }
 0x1dd   :  { %v1137_v40 = vmul.f32 %v1091_v54, %v2763_v41 }
 0x1de   :  { %v1088_v44 = vmul.f32 %v1072_v53, %v1072_v53 }
 0x1df   :  { %v1169_v45 = vadd.f32 1e-05, %v1137_v40 }
 0x1e0   :  { %v1134_v46 = vsel %vm985_vm1, %v1088_v44, 0.0  ;;  %v1154_v44 = vld [vmem:[%s3075_s2 + $0x8] sm:$0xff] }
 0x1e1   :  { %2138 = vrsqrt.f32 %v1169_v45  ;;  %1135 = vadd.xlane.f32.xlu1 %v1134_v46  ;;  %vm1191_vm4 = vweird.f32 %v1169_v45 }
 0x1e4   :  { %v1094_v42 = vpop.xlane.xlu2 %1093 }
 0x1e5   :  { %v1138_v51 = vmul.f32 %v1094_v42, %v2763_v41 }
 0x1e7   :  { %v2139_v55 = vpop.eup %2138  ;;  %v1170_v56 = vadd.f32 1e-05, %v1138_v51 }
 0x1e8   :  { %v1186_v52 = vmul.f32 %v2139_v55, %v1169_v45  ;;  %vm1192_vm3 = vweird.f32 %v2139_v55 }
 0x1e9   :  { %2140 = vrsqrt.f32 %v1170_v56  ;;  %vm1193_vm5 = vmor %vm1191_vm4, %vm1192_vm3  ;;  %vm1201_vm7 = vweird.f32 %v1170_v56 }
 0x1ea   :  { %v1187_v59 = vmul.f32 %v2139_v55, %v1186_v52 }
 0x1ec   :  { %v1188_v11 = vmul.f32 0.5, %v1187_v59  ;;  %v1097_v12 = vpop.xlane.xlu0 %1096 }
 0x1ed   :  { %v1139_v26 = vmul.f32 %v1097_v12, %v2763_v41 }
 0x1ee   :  { %v1189_v27 = vsub.f32 1.5, %v1188_v11 }
 0x1ef   :  { %v2141_v1 = vpop.eup %2140  ;;  %v1171_v8 = vadd.f32 1e-05, %v1139_v26 }
 0x1f0   :  { %v1196_v34 = vmul.f32 %v2141_v1, %v1170_v56  ;;  %v1190_v9 = vmul.f32 %v2139_v55, %v1189_v27  ;;  %vm1202_vm6 = vweird.f32 %v2141_v1  ;;  %v1362_v27 = vld [vmem:[%s3076_s3 + $0x8] sm:$0xff] }
 0x1f1   :  { %2142 = vrsqrt.f32 %v1171_v8  ;;  %vm1203_vm8 = vmor %vm1201_vm7, %vm1202_vm6  ;;  %vm1211_vm10 = vweird.f32 %v1171_v8 }
 0x1f2   :  { %v1197_v10 = vmul.f32 %v2141_v1, %v1196_v34  ;;  %v1194_v14 = vsel %vm1193_vm5, %v2139_v55, %v1190_v9 }
 0x1f3   :  { %v1345_v19 = vmul.f32 %v1194_v14, %v1153_v31 }
 0x1f4   :  { %v1198_v38 = vmul.f32 0.5, %v1197_v10  ;;  %v1100_v39 = vpop.xlane.xlu1 %1099 }
 0x1f5   :  { %v1140_v23 = vmul.f32 %v1100_v39, %v2763_v41  ;;  %1411 = vperm.xlu2 %2133, %v1345_v19   ;;  %v1377_v22 = vmul.f32 %v1345_v19, %v2766_v50 }
 0x1f6   :  { %v1199_v24 = vsub.f32 1.5, %v1198_v38 }
 0x1f7   :  { %v2143_v35 = vpop.eup %2142  ;;  %v1172_v53 = vadd.f32 1e-05, %v1140_v23  ;;  %v1393_v54 = vsub.f32 %v1361_v20, %v1377_v22 }
 0x1f8   :  { %v1206_v40 = vmul.f32 %v2143_v35, %v1171_v8  ;;  %v1200_v45 = vmul.f32 %v2141_v1, %v1199_v24  ;;  %vm1212_vm9 = vweird.f32 %v2143_v35 }
 0x1f9   :  { %2144 = vrsqrt.f32 %v1172_v53  ;;  %vm1213_vm11 = vmor %vm1211_vm10, %vm1212_vm9  ;;  %vm1221_vm13 = vweird.f32 %v1172_v53 }
 0x1fa   :  { %v1207_v46 = vmul.f32 %v2143_v35, %v1206_v40  ;;  %1507 = vperm.xlu1 %2134, %v1393_v54   ;;  %v1204_v42 = vsel %vm1203_vm8, %v2141_v1, %v1200_v45  ;;  %v1155_v1 = vld [vmem:[%s3075_s2 + $0x10] sm:$0xff]  ;;  %v1156_v40 = vld [vmem:[%s3075_s2 + $0x18] sm:$0xff] }
 0x1fb   :  { %v1346_v51 = vmul.f32 %v1204_v42, %v1154_v44 }
 0x1fc   :  { %v1208_v55 = vmul.f32 0.5, %v1207_v46  ;;  %v1103_v50 = vpop.xlane.xlu2 %1102 }
 0x1fd   :  { %v1141_v52 = vmul.f32 %v1103_v50, %v2763_v41  ;;  %1416 = vperm.xlu0 %2135, %v1346_v51   ;;  %v1378_v12 = vmul.f32 %v1346_v51, %v2776_v58  ;;  %v1363_v58 = vld [vmem:[%s3076_s3 + $0x10] sm:$0xff]  ;;  %v1364_v51 = vld [vmem:[%s3076_s3 + $0x18] sm:$0xff] }
 0x1fe   :  { %v1209_v59 = vsub.f32 1.5, %v1208_v55 }
 0x1ff   :  { %v2145_v56 = vpop.eup %2144  ;;  %v1173_v11 = vadd.f32 1e-05, %v1141_v52  ;;  %v1394_v10 = vsub.f32 %v1362_v27, %v1378_v12  ;;  %v1157_v27 = vld [vmem:[%s3075_s2 + $0x20] sm:$0xff] }
 0x200   :  { %v1216_v26 = vmul.f32 %v2145_v56, %v1172_v53  ;;  %v1210_v34 = vmul.f32 %v2143_v35, %v1209_v59  ;;  %vm1222_vm12 = vweird.f32 %v2145_v56 }
 0x201   :  { %2146 = vrsqrt.f32 %v1173_v11  ;;  %vm1223_vm14 = vmor %vm1221_vm13, %vm1222_vm12  ;;  %vm1231_vm0 = vweird.f32 %v1173_v11 }
 0x202   :  { %v1217_v31 = vmul.f32 %v2145_v56, %v1216_v26  ;;  %v1214_v9 = vsel %vm1213_vm11, %v2143_v35, %v1210_v34 }
 0x203   :  { %v1347_v14 = vmul.f32 %v1214_v9, %v1155_v1 }
 0x204   :  { %v1218_v19 = vmul.f32 0.5, %v1217_v31  ;;  %v1106_v38 = vpop.xlane.xlu0 %1105 }
 0x205   :  { %v1142_v8 = vmul.f32 %v1106_v38, %v2763_v41  ;;  %1512 = vperm.xlu0 %2135, %v1394_v10   ;;  %1421 = vperm.xlu1 %2134, %v1347_v14   ;;  %v1379_v39 = vmul.f32 %v1347_v14, %v2782_v63  ;;  %v1365_v10 = vld [vmem:[%s3076_s3 + $0x20] sm:$0xff] }
 0x206   :  { %v1219_v20 = vsub.f32 1.5, %v1218_v19 }
 0x207   :  { %v2147_v23 = vpop.eup %2146  ;;  %v1174_v22 = vadd.f32 1e-05, %v1142_v8  ;;  %v1395_v24 = vsub.f32 %v1363_v58, %v1379_v39 }
 0x208   :  { %v1220_v35 = vmul.f32 %v2145_v56, %v1219_v20  ;;  %v1226_v54 = vmul.f32 %v2147_v23, %v1173_v11  ;;  %vm1232_vm15 = vweird.f32 %v2147_v23  ;;  %v1158_v20 = vld [vmem:[%s3075_s2 + $0x28] sm:$0xff] }
 0x209   :  { %2148 = vrsqrt.f32 %v1174_v22  ;;  %1517 = vperm.xlu2 %2133, %v1395_v24   ;;  %vm1233_vm2 = vmor %vm1231_vm0, %vm1232_vm15  ;;  %vm1241_vm4 = vweird.f32 %v1174_v22 }
 0x20a   :  { %v1224_v44 = vsel %vm1223_vm14, %v2145_v56, %v1220_v35  ;;  %v1227_v45 = vmul.f32 %v2147_v23, %v1226_v54 }
 0x20b   :  { %v1348_v46 = vmul.f32 %v1224_v44, %v1156_v40  ;;  %v1366_v44 = vld [vmem:[%s3076_s3 + $0x28] sm:$0xff] }
 0x20c   :  { %v1228_v42 = vmul.f32 0.5, %v1227_v45  ;;  %v1109_v63 = vpop.xlane.xlu1 %1108 }
 0x20d   :  { %v1143_v55 = vmul.f32 %v1109_v63, %v2763_v41  ;;  %v1380_v53 = vmul.f32 %v1348_v46, %v2788_v2 }
 0x20e   :  { %v1229_v50 = vsub.f32 1.5, %v1228_v42 }
 0x20f   :  { %v2149_v52 = vpop.eup %2148  ;;  %v1175_v59 = vadd.f32 1e-05, %v1143_v55  ;;  %v1396_v12 = vsub.f32 %v1364_v51, %v1380_v53 }
 0x210   :  { %v1230_v26 = vmul.f32 %v2147_v23, %v1229_v50  ;;  %v1236_v56 = vmul.f32 %v2149_v52, %v1174_v22  ;;  %vm1242_vm3 = vweird.f32 %v2149_v52  ;;  %v1159_v50 = vld [vmem:[%s3075_s2 + $0x30] sm:$0xff] }
 0x211   :  { %2150 = vrsqrt.f32 %v1175_v59  ;;  %1522 = vperm.xlu1 %2134, %v1396_v12   ;;  %1426 = vperm.xlu2 %2133, %v1348_v46   ;;  %vm1243_vm5 = vmor %vm1241_vm4, %vm1242_vm3  ;;  %vm1251_vm7 = vweird.f32 %v1175_v59 }
 0x212   :  { %v1234_v1 = vsel %vm1233_vm2, %v2147_v23, %v1230_v26  ;;  %v1237_v34 = vmul.f32 %v2149_v52, %v1236_v56 }
 0x213   :  { %v1349_v31 = vmul.f32 %v1234_v1, %v1157_v27  ;;  %v1367_v27 = vld [vmem:[%s3076_s3 + $0x30] sm:$0xff] }
 0x214   :  { %v1238_v2 = vmul.f32 0.5, %v1237_v34  ;;  %v1112_v9 = vpop.xlane.xlu2 %1111 }
 0x215   :  { %v1144_v11 = vmul.f32 %v1112_v9, %v2763_v41  ;;  %v1381_v14 = vmul.f32 %v1349_v31, %v2794_v32 }
 0x216   :  { %v1239_v19 = vsub.f32 1.5, %v1238_v2 }
 0x217   :  { %v2151_v38 = vpop.eup %2150  ;;  %v1176_v58 = vadd.f32 1e-05, %v1144_v11  ;;  %v1397_v8 = vsub.f32 %v1365_v10, %v1381_v14  ;;  %v1160_v14 = vld [vmem:[%s3075_s2 + $0x38] sm:$0xff] }
 0x218   :  { %v1246_v39 = vmul.f32 %v2151_v38, %v1175_v59  ;;  %v1240_v23 = vmul.f32 %v2149_v52, %v1239_v19  ;;  %vm1252_vm6 = vweird.f32 %v2151_v38 }
 0x219   :  { %2152 = vrsqrt.f32 %v1176_v58  ;;  %1527 = vperm.xlu0 %2135, %v1397_v8   ;;  %1431 = vperm.xlu2 %2133, %v1349_v31   ;;  %vm1253_vm8 = vmor %vm1251_vm7, %vm1252_vm6  ;;  %vm1261_vm10 = vweird.f32 %v1176_v58 }
 0x21a   :  { %v1247_v24 = vmul.f32 %v2151_v38, %v1246_v39  ;;  %v1244_v35 = vsel %vm1243_vm5, %v2149_v52, %v1240_v23 }
 0x21b   :  { %v1350_v54 = vmul.f32 %v1244_v35, %v1158_v20  ;;  %v1368_v20 = vld [vmem:[%s3076_s3 + $0x38] sm:$0xff] }
 0x21c   :  { %v1248_v32 = vmul.f32 0.5, %v1247_v24  ;;  %v1115_v40 = vpop.xlane.xlu0 %1114 }
 0x21d   :  { %v1145_v22 = vmul.f32 %v1115_v40, %v2763_v41  ;;  %1436 = vperm.xlu1 %2134, %v1350_v54   ;;  %v1382_v45 = vmul.f32 %v1350_v54, %v2800_v16 }
 0x21e   :  { %v1249_v46 = vsub.f32 1.5, %v1248_v32 }
 0x21f   :  { %v2153_v42 = vpop.eup %2152  ;;  %v1177_v63 = vadd.f32 1e-05, %v1145_v22  ;;  %v1398_v51 = vsub.f32 %v1366_v44, %v1382_v45  ;;  %v1161_v44 = vld [vmem:[%s3075_s2 + $0x40] sm:$0xff] }
 0x220   :  { %v1250_v55 = vmul.f32 %v2151_v38, %v1249_v46  ;;  %v1256_v53 = vmul.f32 %v2153_v42, %v1176_v58  ;;  %vm1262_vm9 = vweird.f32 %v2153_v42 }
 0x221   :  { %2154 = vrsqrt.f32 %v1177_v63  ;;  %1532 = vperm.xlu2 %2133, %v1398_v51   ;;  %vm1263_vm11 = vmor %vm1261_vm10, %vm1262_vm9  ;;  %vm1271_vm13 = vweird.f32 %v1177_v63 }
 0x222   :  { %v1254_v52 = vsel %vm1253_vm8, %v2151_v38, %v1250_v55  ;;  %v1257_v12 = vmul.f32 %v2153_v42, %v1256_v53  ;;  %v1369_v55 = vld [vmem:[%s3076_s3 + $0x40] sm:$0xff] }
 0x223   :  { %v1351_v26 = vmul.f32 %v1254_v52, %v1159_v50 }
 0x224   :  { %v1258_v56 = vmul.f32 0.5, %v1257_v12  ;;  %v1118_v16 = vpop.xlane.xlu1 %1117 }
 0x225   :  { %v1146_v1 = vmul.f32 %v1118_v16, %v2763_v41  ;;  %v1383_v59 = vmul.f32 %v1351_v26, %v2806_v49 }
 0x226   :  { %v1259_v34 = vsub.f32 1.5, %v1258_v56 }
 0x227   :  { %v2155_v31 = vpop.eup %2154  ;;  %v1178_v2 = vadd.f32 1e-05, %v1146_v1  ;;  %v1399_v9 = vsub.f32 %v1367_v27, %v1383_v59  ;;  %v1162_v27 = vld [vmem:[%s3075_s2 + $0x48] sm:$0xff] }
 0x228   :  { %v1260_v10 = vmul.f32 %v2153_v42, %v1259_v34  ;;  %v1266_v11 = vmul.f32 %v2155_v31, %v1177_v63  ;;  %vm1272_vm12 = vweird.f32 %v2155_v31 }
 0x229   :  { %2156 = vrsqrt.f32 %v1178_v2  ;;  %1537 = vperm.xlu1 %2134, %v1399_v9   ;;  %1441 = vperm.xlu2 %2133, %v1351_v26   ;;  %vm1273_vm14 = vmor %vm1271_vm13, %vm1272_vm12  ;;  %vm1281_vm0 = vweird.f32 %v1178_v2  ;;  %v1370_v9 = vld [vmem:[%s3076_s3 + $0x48] sm:$0xff] }
 0x22a   :  { %v1264_v19 = vsel %vm1263_vm11, %v2153_v42, %v1260_v10  ;;  %v1267_v38 = vmul.f32 %v2155_v31, %v1266_v11 }
 0x22b   :  { %v1352_v8 = vmul.f32 %v1264_v19, %v1160_v14 }
 0x22c   :  { %v1268_v49 = vmul.f32 0.5, %v1267_v38  ;;  %v1121_v39 = vpop.xlane.xlu2 %1120 }
 0x22d   :  { %v1147_v58 = vmul.f32 %v1121_v39, %v2763_v41  ;;  %v1384_v23 = vmul.f32 %v1352_v8, %v2812_v25 }
 0x22e   :  { %v1269_v24 = vsub.f32 1.5, %v1268_v49  ;;  %v1163_v49 = vld [vmem:[%s3075_s2 + $0x50] sm:$0xff] }
 0x22f   :  { %v2157_v35 = vpop.eup %2156  ;;  %v1179_v54 = vadd.f32 1e-05, %v1147_v58  ;;  %v1400_v32 = vsub.f32 %v1368_v20, %v1384_v23 }
 0x230   :  { %v1276_v40 = vmul.f32 %v2157_v35, %v1178_v2  ;;  %v1270_v22 = vmul.f32 %v2155_v31, %v1269_v24  ;;  %vm1282_vm15 = vweird.f32 %v2157_v35 }
 0x231   :  { %2158 = vrsqrt.f32 %v1179_v54  ;;  %1542 = vperm.xlu0 %2135, %v1400_v32   ;;  %1446 = vperm.xlu1 %2134, %v1352_v8   ;;  %vm1283_vm2 = vmor %vm1281_vm0, %vm1282_vm15  ;;  %vm1291_vm4 = vweird.f32 %v1179_v54 }
 0x232   :  { %v1277_v45 = vmul.f32 %v2157_v35, %v1276_v40  ;;  %v1274_v46 = vsel %vm1273_vm14, %v2155_v31, %v1270_v22 }
 0x233   :  { %v1353_v42 = vmul.f32 %v1274_v46, %v1161_v44 }
 0x234   :  { %v1278_v25 = vmul.f32 0.5, %v1277_v45  ;;  %v1124_v51 = vpop.xlane.xlu0 %1123 }
 0x235   :  { %v1148_v63 = vmul.f32 %v1124_v51, %v2763_v41  ;;  %v1385_v53 = vmul.f32 %v1353_v42, %v2818_v37 }
 0x236   :  { %v1279_v50 = vsub.f32 1.5, %v1278_v25 }
 0x237   :  { %v2159_v52 = vpop.eup %2158  ;;  %v1180_v12 = vadd.f32 1e-05, %v1148_v63  ;;  %v1401_v26 = vsub.f32 %v1369_v55, %v1385_v53 }
 0x238   :  { %v1280_v56 = vmul.f32 %v2157_v35, %v1279_v50  ;;  %v1286_v16 = vmul.f32 %v2159_v52, %v1179_v54  ;;  %vm1292_vm3 = vweird.f32 %v2159_v52  ;;  %v1372_v50 = vld [vmem:[%s3076_s3 + $0x58] sm:$0xff] }
 0x239   :  { %2160 = vrsqrt.f32 %v1180_v12  ;;  %1451 = vperm.xlu0 %2135, %v1353_v42   ;;  %1547 = vperm.xlu2 %2133, %v1401_v26   ;;  %vm1293_vm5 = vmor %vm1291_vm4, %vm1292_vm3  ;;  %vm1301_vm7 = vweird.f32 %v1180_v12  ;;  %v1164_v42 = vld [vmem:[%s3075_s2 + $0x58] sm:$0xff] }
 0x23a   :  { %v1284_v1 = vsel %vm1283_vm2, %v2157_v35, %v1280_v56  ;;  %v1287_v59 = vmul.f32 %v2159_v52, %v1286_v16  ;;  %v1371_v35 = vld [vmem:[%s3076_s3 + $0x50] sm:$0xff] }
 0x23b   :  { %v1354_v34 = vmul.f32 %v1284_v1, %v1162_v27 }
 0x23c   :  { %v1288_v37 = vmul.f32 0.5, %v1287_v59  ;;  %v1127_v31 = vpop.xlane.xlu1 %1126 }
 0x23d   :  { %v1149_v2 = vmul.f32 %v1127_v31, %v2763_v41  ;;  %v1386_v10 = vmul.f32 %v1354_v34, %v2824_v43 }
 0x23e   :  { %v1289_v11 = vsub.f32 1.5, %v1288_v37 }
 0x23f   :  { %v2161_v14 = vpop.eup %2160  ;;  %v1181_v19 = vadd.f32 1e-05, %v1149_v2  ;;  %v1402_v38 = vsub.f32 %v1370_v9, %v1386_v10  ;;  %v1373_v10 = vld [vmem:[%s3076_s3 + $0x60] sm:$0xff] }
 0x240   :  { %v1296_v8 = vmul.f32 %v2161_v14, %v1180_v12  ;;  %v1290_v39 = vmul.f32 %v2159_v52, %v1289_v11  ;;  %vm1302_vm6 = vweird.f32 %v2161_v14 }
 0x241   :  { %2162 = vrsqrt.f32 %v1181_v19  ;;  %1552 = vperm.xlu1 %2134, %v1402_v38   ;;  %1456 = vperm.xlu2 %2133, %v1354_v34   ;;  %vm1303_vm8 = vmor %vm1301_vm7, %vm1302_vm6  ;;  %vm1311_vm10 = vweird.f32 %v1181_v19  ;;  %v1165_v34 = vld [vmem:[%s3075_s2 + $0x60] sm:$0xff] }
 0x242   :  { %v1297_v20 = vmul.f32 %v2161_v14, %v1296_v8  ;;  %v1294_v58 = vsel %vm1293_vm5, %v2159_v52, %v1290_v39 }
 0x243   :  { %v1355_v23 = vmul.f32 %v1294_v58, %v1163_v49 }
 0x244   :  { %v1298_v43 = vmul.f32 0.5, %v1297_v20  ;;  %v1130_v24 = vpop.xlane.xlu2 %1129 }
 0x245   :  { %v1150_v54 = vmul.f32 %v1130_v24, %v2763_v41  ;;  %v1387_v32 = vmul.f32 %v1355_v23, %v2830_v57 }
 0x246   :  { %v1299_v40 = vsub.f32 1.5, %v1298_v43 }
 0x247   :  { %v2163_v44 = vpop.eup %2162  ;;  %v1182_v22 = vadd.f32 1e-05, %v1150_v54  ;;  %v1403_v45 = vsub.f32 %v1371_v35, %v1387_v32  ;;  %v1167_v32 = vld [vmem:[%s3075_s2 + $0x70] sm:$0xff] }
 0x248   :  { %v1306_v46 = vmul.f32 %v2163_v44, %v1181_v19  ;;  %v1300_v25 = vmul.f32 %v2161_v14, %v1299_v40  ;;  %vm1312_vm9 = vweird.f32 %v2163_v44 }
 0x249   :  { %2164 = vrsqrt.f32 %v1182_v22  ;;  %1461 = vperm.xlu1 %2134, %v1355_v23   ;;  %1557 = vperm.xlu0 %2135, %v1403_v45   ;;  %vm1313_vm11 = vmor %vm1311_vm10, %vm1312_vm9  ;;  %vm1321_vm13 = vweird.f32 %v1182_v22 }
 0x24a   :  { %v1307_v51 = vmul.f32 %v2163_v44, %v1306_v46  ;;  %v1304_v55 = vsel %vm1303_vm8, %v2161_v14, %v1300_v25 }
 0x24b   :  { %v1356_v63 = vmul.f32 %v1304_v55, %v1164_v42  ;;  %v1168_v55 = vld [vmem:[%s3075_s2 + $0x78] sm:$0xff] }
 0x24c   :  { %v1308_v57 = vmul.f32 0.5, %v1307_v51  ;;  %v1133_v53 = vpop.xlane.xlu0 %1132 }
 0x24d   :  { %v1151_v52 = vmul.f32 %v1133_v53, %v2763_v41  ;;  %v1388_v12 = vmul.f32 %v1356_v63, %v2836_v0 }
 0x24e   :  { %v1309_v26 = vsub.f32 1.5, %v1308_v57  ;;  %v1374_v57 = vld [vmem:[%s3076_s3 + $0x68] sm:$0xff] }
 0x24f   :  { %v2165_v56 = vpop.eup %2164  ;;  %v1183_v16 = vadd.f32 1e-05, %v1151_v52  ;;  %v1404_v27 = vsub.f32 %v1372_v50, %v1388_v12  ;;  %v1412_v25 = vpop.permute.xlu2 %1411 }
 0x250   :  { %v1310_v1 = vmul.f32 %v2163_v44, %v1309_v26  ;;  %v1316_v59 = vmul.f32 %v2165_v56, %v1182_v22  ;;  %vm1322_vm12 = vweird.f32 %v2165_v56  ;;  %v1489_v50 = vmul.f32 %v1412_v25, %v2683_v60  ;;  %v1375_v60 = vld [vmem:[%s3076_s3 + $0x70] sm:$0xff] }
 0x251   :  { %2166 = vrsqrt.f32 %v1183_v16  ;;  %1466 = vperm.xlu0 %2135, %v1356_v63   ;;  %1562 = vperm.xlu2 %2133, %v1404_v27   ;;  %vm1323_vm14 = vmor %vm1321_vm13, %vm1322_vm12  ;;  %vm1331_vm0 = vweird.f32 %v1183_v16 }
 0x252   :  { %v1314_v37 = vsel %vm1313_vm11, %v2163_v44, %v1310_v1  ;;  %v1317_v31 = vmul.f32 %v2165_v56, %v1316_v59 }
 0x253   :  { %v1357_v9 = vmul.f32 %v1314_v37, %v1165_v34 }
 0x254   :  { %v1318_v0 = vmul.f32 0.5, %v1317_v31  ;;  %v1136_v2 = vpop.xlane.xlu1 %1135 }
 0x255   :  { %v1152_v11 = vmul.f32 %v1136_v2, %v2763_v41  ;;  %v1389_v14 = vmul.f32 %v1357_v9, %v2842_v33  ;;  %v1166_v41 = vld [vmem:[%s3075_s2 + $0x68] sm:$0xff] }
 0x256   :  { %v1319_v19 = vsub.f32 1.5, %v1318_v0 }
 0x257   :  { %v2167_v38 = vpop.eup %2166  ;;  %v1184_v8 = vadd.f32 1e-05, %v1152_v11  ;;  %v1405_v49 = vsub.f32 %v1373_v10, %v1389_v14 }
 0x258   :  { %v1326_v39 = vmul.f32 %v2167_v38, %v1183_v16  ;;  %v1320_v20 = vmul.f32 %v2165_v56, %v1319_v19  ;;  %vm1332_vm15 = vweird.f32 %v2167_v38 }
 0x259   :  { %2168 = vrsqrt.f32 %v1184_v8  ;;  %1567 = vperm.xlu1 %2134, %v1405_v49   ;;  %1471 = vperm.xlu2 %2133, %v1357_v9   ;;  %vm1333_vm2 = vmor %vm1331_vm0, %vm1332_vm15  ;;  %vm1341_vm4 = vweird.f32 %v1184_v8 }
 0x25a   :  { %v1327_v58 = vmul.f32 %v2167_v38, %v1326_v39  ;;  %v1324_v43 = vsel %vm1323_vm14, %v2165_v56, %v1320_v20 }
 0x25b   :  { %v1358_v35 = vmul.f32 %v1324_v43, %v1166_v41 }
 0x25c   :  { %v1328_v23 = vmul.f32 0.5, %v1327_v58 }
 0x25d   :  { %v1390_v51 = vmul.f32 %v1358_v35, %v2848_v13  ;;  %v1376_v13 = vld [vmem:[%s3076_s3 + $0x78] sm:$0xff] }
 0x25e   :  { %v1329_v33 = vsub.f32 1.5, %v1328_v23 }
 0x25f   :  { %v2169_v24 = vpop.eup %2168  ;;  %v1406_v12 = vsub.f32 %v1374_v57, %v1390_v51 }
 0x260   :  { %v1336_v54 = vmul.f32 %v2169_v24, %v1184_v8  ;;  %v1330_v40 = vmul.f32 %v2167_v38, %v1329_v33  ;;  %vm1342_vm3 = vweird.f32 %v2169_v24 }
 0x261   :  { %1476 = vperm.xlu1 %2134, %v1358_v35   ;;  %vm1343_vm5 = vmor %vm1341_vm4, %vm1342_vm3 }
 0x262   :  { %v1337_v44 = vmul.f32 %v2169_v24, %v1336_v54  ;;  %v1334_v22 = vsel %vm1333_vm2, %v2167_v38, %v1330_v40 }
 0x263   :  { %v1359_v45 = vmul.f32 %v1334_v22, %v1167_v32  ;;  %v1518_v27 = vpop.permute.xlu2 %1517 }
 0x264   :  { %v1338_v46 = vmul.f32 0.5, %v1337_v44 }
 0x265   :  { %1481 = vperm.xlu0 %2135, %v1359_v45   ;;  %v1391_v37 = vmul.f32 %v1359_v45, %v2854_v48 }
 0x266   :  { %v1339_v42 = vsub.f32 1.5, %v1338_v46 }
 0x267   :  { %v1407_v31 = vsub.f32 %v1375_v60, %v1391_v37 }
 0x268   :  { %v1340_v63 = vmul.f32 %v2169_v24, %v1339_v42 }
 0x26a   :  { %v1344_v53 = vsel %vm1343_vm5, %v2169_v24, %v1340_v63 }
 0x26b   :  { %v1360_v52 = vmul.f32 %v1344_v53, %v1168_v55  ;;  %v1427_v48 = vpop.permute.xlu2 %1426 }
 0x26c   :  { %v1508_v26 = vpop.permute.xlu1 %1507 }
 0x26d   :  { %v1585_v56 = vadd.f32 %v1508_v26, %v1489_v50  ;;  %1486 = vperm.xlu2 %2133, %v1360_v52   ;;  %1572 = vperm.xlu0 %2135, %v1406_v12   ;;  %v1392_v16 = vmul.f32 %v1360_v52, %v2860_v30 }
 0x26f   :  { %v1601_v1 = vmax.f32 %v1585_v56, 0.0  ;;  %v1417_v59 = vpop.permute.xlu0 %1416  ;;  %v1408_v34 = vsub.f32 %v1376_v13, %v1392_v16 }
 0x270   :  { %v1490_v30 = vmul.f32 %v1417_v59, %v2689_v5  ;;  %v1492_v5 = vmul.f32 %v1427_v48, %v2701_v29 }
 0x271   :  { %1617 = vst.msk [vmem:[%s3077_s4] sm:$0xff] %vm985_vm1, %v1601_v1  ;;  %1582 = vperm.xlu1 %2134, %v1408_v34  }
 0x273   :  { %v1432_v38 = vpop.permute.xlu2 %1431 }
 0x274   :  { %v1493_v39 = vmul.f32 %v1432_v38, %v2707_v47 }
 0x275   :  { %1577 = vperm.xlu2 %2133, %v1407_v31  }
 0x277   :  { %v1422_v9 = vpop.permute.xlu1 %1421  ;;  %v1513_v0 = vpop.permute.xlu0 %1512 }
 0x278   :  { %v1491_v2 = vmul.f32 %v1422_v9, %v2695_v18  ;;  %v1586_v10 = vadd.f32 %v1513_v0, %v1490_v30 }
 0x27a   :  { %v1587_v11 = vadd.f32 %v1518_v27, %v1491_v2  ;;  %v1602_v14 = vmax.f32 %v1586_v10, 0.0 }
 0x27b   :  { %v1533_v23 = vpop.permute.xlu2 %1532 }
 0x27c   :  { %v1603_v19 = vmax.f32 %v1587_v11, 0.0  ;;  %1618 = vst.msk [vmem:[%s3077_s4 + $0x8] sm:$0xff] %vm985_vm1, %v1602_v14 }
 0x27e   :  { %1619 = vst.msk [vmem:[%s3077_s4 + $0x10] sm:$0xff] %vm985_vm1, %v1603_v19 }
 0x283   :  { %v1523_v8 = vpop.permute.xlu1 %1522  ;;  %v1442_v47 = vpop.permute.xlu2 %1441 }
 0x284   :  { %v1588_v18 = vadd.f32 %v1523_v8, %v1492_v5  ;;  %v1495_v35 = vmul.f32 %v1442_v47, %v2719_v4 }
 0x286   :  { %v1604_v49 = vmax.f32 %v1588_v18, 0.0 }
 0x288   :  { %1620 = vst.msk [vmem:[%s3077_s4 + $0x18] sm:$0xff] %vm985_vm1, %v1604_v49 }
 0x28b   :  { %v1528_v20 = vpop.permute.xlu0 %1527 }
 0x28c   :  { %v1589_v58 = vadd.f32 %v1528_v20, %v1493_v39 }
 0x28e   :  { %v1605_v41 = vmax.f32 %v1589_v58, 0.0 }
 0x28f   :  { %v1437_v43 = vpop.permute.xlu1 %1436 }
 0x290   :  { %1621 = vst.msk [vmem:[%s3077_s4 + $0x20] sm:$0xff] %vm985_vm1, %v1605_v41  ;;  %v1494_v29 = vmul.f32 %v1437_v43, %v2713_v61 }
 0x292   :  { %v1590_v33 = vadd.f32 %v1533_v23, %v1494_v29 }
 0x293   :  { %v1548_v45 = vpop.permute.xlu2 %1547 }
 0x294   :  { %v1606_v24 = vmax.f32 %v1590_v33, 0.0 }
 0x296   :  { %1622 = vst.msk [vmem:[%s3077_s4 + $0x28] sm:$0xff] %vm985_vm1, %v1606_v24 }
 0x29b   :  { %v1538_v54 = vpop.permute.xlu1 %1537  ;;  %v1457_v55 = vpop.permute.xlu2 %1456 }
 0x29c   :  { %v1591_v32 = vadd.f32 %v1538_v54, %v1495_v35  ;;  %v1498_v57 = vmul.f32 %v1457_v55, %v2733_v36 }
 0x29e   :  { %v1607_v40 = vmax.f32 %v1591_v32, 0.0 }
 0x2a0   :  { %1623 = vst.msk [vmem:[%s3077_s4 + $0x30] sm:$0xff] %vm985_vm1, %v1607_v40 }
 0x2a3   :  { %v1447_v44 = vpop.permute.xlu1 %1446  ;;  %v1543_v61 = vpop.permute.xlu0 %1542 }
 0x2a4   :  { %v1496_v22 = vmul.f32 %v1447_v44, %v2723_v15 }
 0x2a6   :  { %v1592_v46 = vadd.f32 %v1543_v61, %v1496_v22 }
 0x2a8   :  { %v1608_v42 = vmax.f32 %v1592_v46, 0.0 }
 0x2aa   :  { %1624 = vst.msk [vmem:[%s3077_s4 + $0x38] sm:$0xff] %vm985_vm1, %v1608_v42 }
 0x2ab   :  { %v1452_v4 = vpop.permute.xlu0 %1451  ;;  %v1563_v26 = vpop.permute.xlu2 %1562 }
 0x2ac   :  { %v1497_v25 = vmul.f32 %v1452_v4, %v2728_v21 }
 0x2ae   :  { %v1593_v51 = vadd.f32 %v1548_v45, %v1497_v25 }
 0x2b0   :  { %v1609_v63 = vmax.f32 %v1593_v51, 0.0 }
 0x2b2   :  { %1625 = vst.msk [vmem:[%s3077_s4 + $0x40] sm:$0xff] %vm985_vm1, %v1609_v63 }
 0x2b3   :  { %v1553_v15 = vpop.permute.xlu1 %1552  ;;  %v1472_v1 = vpop.permute.xlu2 %1471 }
 0x2b4   :  { %v1594_v53 = vadd.f32 %v1553_v15, %v1498_v57  ;;  %v1501_v34 = vmul.f32 %v1472_v1, %v2748_v3 }
 0x2b6   :  { %v1610_v50 = vmax.f32 %v1594_v53, 0.0 }
 0x2b8   :  { %1626 = vst.msk [vmem:[%s3077_s4 + $0x48] sm:$0xff] %vm985_vm1, %v1610_v50 }
 0x2bb   :  { %v1462_v52 = vpop.permute.xlu1 %1461  ;;  %v1558_v21 = vpop.permute.xlu0 %1557 }
 0x2bc   :  { %v1499_v12 = vmul.f32 %v1462_v52, %v2738_v7 }
 0x2be   :  { %v1595_v13 = vadd.f32 %v1558_v21, %v1499_v12 }
 0x2c0   :  { %v1611_v36 = vmax.f32 %v1595_v13, 0.0 }
 0x2c2   :  { %1627 = vst.msk [vmem:[%s3077_s4 + $0x50] sm:$0xff] %vm985_vm1, %v1611_v36 }
 0x2c3   :  { %v1467_v56 = vpop.permute.xlu0 %1466 }
 0x2c4   :  { %v1500_v16 = vmul.f32 %v1467_v56, %v2743_v62 }
 0x2c6   :  { %v1596_v27 = vadd.f32 %v1563_v26, %v1500_v16 }
 0x2c7   :  { %v1487_v31 = vpop.permute.xlu2 %1486 }
 0x2c8   :  { %v1612_v59 = vmax.f32 %v1596_v27, 0.0  ;;  %v1504_v14 = vmul.f32 %v1487_v31, %v2768_v6 }
 0x2ca   :  { %1628 = vst.msk [vmem:[%s3077_s4 + $0x58] sm:$0xff] %vm985_vm1, %v1612_v59 }
 0x2cb   :  { %v1568_v7 = vpop.permute.xlu1 %1567 }
 0x2cc   :  { %v1597_v37 = vadd.f32 %v1568_v7, %v1501_v34 }
 0x2ce   :  { %v1613_v60 = vmax.f32 %v1597_v37, 0.0 }
 0x2cf   :  { %v1578_v9 = vpop.permute.xlu2 %1577 }
 0x2d0   :  { %1629 = vst.msk [vmem:[%s3077_s4 + $0x60] sm:$0xff] %vm985_vm1, %v1613_v60 }
 0x2d3   :  { %v1477_v3 = vpop.permute.xlu1 %1476 }
 0x2d4   :  { %v1502_v10 = vmul.f32 %v1477_v3, %v2753_v17 }
 0x2d7   :  { %v1482_v62 = vpop.permute.xlu0 %1481 }
 0x2d8   :  { %v1503_v30 = vmul.f32 %v1482_v62, %v2758_v28 }
 0x2da   :  { %v1599_v0 = vadd.f32 %v1578_v9, %v1503_v30 }
 0x2dc   :  { %v1615_v2 = vmax.f32 %v1599_v0, 0.0 }
 0x2de   :  { %1631 = vst.msk [vmem:[%s3077_s4 + $0x70] sm:$0xff] %vm985_vm1, %v1615_v2 }
 0x2df   :  { %v1573_v48 = vpop.permute.xlu0 %1572 }
 0x2e0   :  { %v1598_v11 = vadd.f32 %v1573_v48, %v1502_v10 }
 0x2e2   :  { %v1614_v19 = vmax.f32 %v1598_v11, 0.0 }
 0x2e3   :  { %v1583_v5 = vpop.permute.xlu1 %1582 }
 0x2e4   :  { %1630 = vst.msk [vmem:[%s3077_s4 + $0x68] sm:$0xff] %vm985_vm1, %v1614_v19  ;;  %v1600_v28 = vadd.f32 %v1583_v5, %v1504_v14 }
 0x2e6   :  { %v1616_v38 = vmax.f32 %v1600_v28, 0.0 }
 0x2e8   :  { %1632 = vst.msk [vmem:[%s3077_s4 + $0x78] sm:$0xff] %vm985_vm1, %v1616_v38 }

</bundles_post_ra>
